<compile_context>
chip_gen: v6e
topology: v6e:2x2x1
jax: 0.10.0
libtpu: 0.0.40
codegen_flags: <defaults>
</compile_context>

<pallas_src>
import functools
import math

import jax
import jax.numpy as jnp
from jax.experimental import pallas as pl
from jax.experimental.pallas import tpu as pltpu


# ------------------------------ Pallas kernel -------------------------------

def _transformer_main_kernel(
    # ---- inputs ----
    x_ref,        # (Bt, T, Cin)  f32
    emb_w_ref,    # (Cin, D)      f32
    emb_b_ref,    # (1, D)        f32
    pe_ref,       # (T, D)        f32
    qkv_w_ref,    # (D, 3*D)      bf16   per-layer block (layer dim squeezed)
    qkv_b_ref,    # (1, 3*D)      f32
    out_w_ref,    # (D, D)        bf16
    out_b_ref,    # (1, D)        f32
    ln1_g_ref,    # (1, D)        f32
    ln1_b_ref,    # (1, D)        f32
    ff1_w_ref,    # (D, F)        bf16
    ff1_b_ref,    # (1, F)        f32
    ff2_w_ref,    # (F, D)        bf16
    ff2_b_ref,    # (1, D)        f32
    ln2_g_ref,    # (1, D)        f32
    ln2_b_ref,    # (1, D)        f32
    fc_w_ref,     # (D, O)        f32
    fc_b_ref,     # (1, O)        f32
    # ---- outputs ----
    out_ref,      # (Bt, O)       f32
    # ---- scratch ----
    h_ref,        # (Bt*T, D)     f32 activations, carried across the layer axis
    *, nhead, compute_dtype):
  f32 = jnp.float32
  cdt = compute_dtype
  layer = pl.program_id(1)                 # layer axis is the innermost grid dim
  num_layers = pl.num_programs(1)
  Bt, T, _ = x_ref.shape
  D = emb_w_ref.shape[1]
  dh = D // nhead
  scale = 1.0 / math.sqrt(dh)

  def layernorm(v, g, b):
    mu = jnp.mean(v, axis=-1, keepdims=True)
    c = v - mu
    var = jnp.mean(c * c, axis=-1, keepdims=True)
    return c * jax.lax.rsqrt(var + 1e-5) * g + b

  # ---- embedding + positional encoding (first layer step of each batch tile) --
  @pl.when(layer == 0)
  def _():
    x2 = x_ref[...].reshape(Bt * T, -1)
    emb = jnp.dot(x2.astype(cdt), emb_w_ref[...].astype(cdt),
                  preferred_element_type=f32) + emb_b_ref[...]
    emb = emb.reshape(Bt, T, D) + pe_ref[...]           # broadcast PE over batch
    h_ref[...] = emb.reshape(Bt * T, D)

  h = h_ref[...]                                        # (Bt*T, D), f32
  h_c = h.astype(cdt)                                   # hoisted: cast once/layer

  # ---- multi-head self-attention -------------------------------------------
  # One fused QKV matmul: (Bt*T, D) @ (D, 3D) -> (Bt*T, 3D), then per-head static
  # lane slices.  qkv_w columns are ordered [q heads | k heads | v heads].
  qkv = jnp.dot(h_c, qkv_w_ref[...], preferred_element_type=f32) + qkv_b_ref[...]

  heads_out = []
  for hd in range(nhead):                               # small static unroll
    q = qkv[:, hd * dh:(hd + 1) * dh] * scale           # (Bt*T, dh)
    k = qkv[:, D + hd * dh: D + (hd + 1) * dh]
    v = qkv[:, 2 * D + hd * dh: 2 * D + (hd + 1) * dh]
    q3 = q.reshape(Bt, T, dh).astype(cdt)
    k3 = k.reshape(Bt, T, dh).astype(cdt)
    v3 = v.reshape(Bt, T, dh).astype(cdt)
    s = jnp.einsum("bqd,bkd->bqk", q3, k3,
                   preferred_element_type=f32)          # (Bt, T, T) f32
    s = s - jnp.max(s, axis=-1, keepdims=True)
    p = jnp.exp(s)
    p = p / jnp.sum(p, axis=-1, keepdims=True)          # exact softmax (f32)
    o = jnp.einsum("bqk,bkd->bqd", p.astype(cdt), v3,
                   preferred_element_type=f32)          # (Bt, T, dh)
    heads_out.append(o.reshape(Bt * T, dh))

  # Concatenate heads -> full-width out projection (contraction depth D).
  concat = jnp.concatenate(heads_out, axis=-1)          # (Bt*T, D)
  proj = jnp.dot(concat.astype(cdt), out_w_ref[...],
                 preferred_element_type=f32) + out_b_ref[...]

  # ---- residual + layernorm 1 (post-norm, PyTorch default) ----
  y = layernorm(h + proj, ln1_g_ref[...], ln1_b_ref[...])
  y_c = y.astype(cdt)

  # ---- feed-forward + residual + layernorm 2 ----
  f1 = jnp.maximum(jnp.dot(y_c, ff1_w_ref[...], preferred_element_type=f32)
                   + ff1_b_ref[...], 0.0)
  f2 = jnp.dot(f1.astype(cdt), ff2_w_ref[...],
               preferred_element_type=f32) + ff2_b_ref[...]
  z = layernorm(y + f2, ln2_g_ref[...], ln2_b_ref[...])
  h_ref[...] = z

  # ---- final head on the last timestep (last layer step only) ----
  @pl.when(layer == num_layers - 1)
  def _():
    last = z.reshape(Bt, T, D)[:, T - 1, :]             # (Bt, D)
    out = jnp.dot(last.astype(cdt), fc_w_ref[...].astype(cdt),
                  preferred_element_type=f32) + fc_b_ref[...]
    out_ref[...] = out.astype(out_ref.dtype)


# ------------------------------ host wrapper --------------------------------

def transformer_main_forward(x, params, *, nhead, compute_dtype=jnp.bfloat16,
                             batch_tile=None):
  """x: (B, T, input_size) float32 -> (B, output_len) float32."""
  B, T, c_in = x.shape
  d_model = params["emb_w"].shape[1]
  assert d_model % nhead == 0
  n_layers = params["qkv_w"].shape[0]
  d_ff = params["ff1_w"].shape[2]
  out_len = params["fc_w"].shape[1]
  pe = params["pe"][:T]                      # static slice of precomputed table

  tb = B if batch_tile is None else batch_tile
  assert B % tb == 0
  # TODO(synk): for production batches, pick tb so the (tb, out_len) output tile
  # and (tb*T, D) scratch satisfy the (8, 128) tiling constraints and fit the
  # 64 MiB v7x VMEM budget; here tb == B (full-dim blocks are always legal).

  grid_spec = pltpu.PrefetchScalarGridSpec(
      num_scalar_prefetch=0,
      grid=(B // tb, n_layers),              # (batch tiles, layers); layer innermost
      in_specs=[
          pl.BlockSpec((tb, T, c_in), lambda b, l: (b, 0, 0)),
          pl.BlockSpec((c_in, d_model), lambda b, l: (0, 0)),
          pl.BlockSpec((1, d_model), lambda b, l: (0, 0)),
          pl.BlockSpec((T, d_model), lambda b, l: (0, 0)),
          pl.BlockSpec((None, d_model, 3 * d_model), lambda b, l: (l, 0, 0)),
          pl.BlockSpec((None, 1, 3 * d_model), lambda b, l: (l, 0, 0)),
          pl.BlockSpec((None, d_model, d_model), lambda b, l: (l, 0, 0)),
          pl.BlockSpec((None, 1, d_model), lambda b, l: (l, 0, 0)),
          pl.BlockSpec((None, 1, d_model), lambda b, l: (l, 0, 0)),   # ln1_g
          pl.BlockSpec((None, 1, d_model), lambda b, l: (l, 0, 0)),   # ln1_b
          pl.BlockSpec((None, d_model, d_ff), lambda b, l: (l, 0, 0)),
          pl.BlockSpec((None, 1, d_ff), lambda b, l: (l, 0, 0)),
          pl.BlockSpec((None, d_ff, d_model), lambda b, l: (l, 0, 0)),
          pl.BlockSpec((None, 1, d_model), lambda b, l: (l, 0, 0)),
          pl.BlockSpec((None, 1, d_model), lambda b, l: (l, 0, 0)),   # ln2_g
          pl.BlockSpec((None, 1, d_model), lambda b, l: (l, 0, 0)),   # ln2_b
          pl.BlockSpec((d_model, out_len), lambda b, l: (0, 0)),
          pl.BlockSpec((1, out_len), lambda b, l: (0, 0)),
      ],
      out_specs=pl.BlockSpec((tb, out_len), lambda b, l: (b, 0)),
      scratch_shapes=[pltpu.VMEM((tb * T, d_model), jnp.float32)],
  )
  return pl.pallas_call(
      functools.partial(_transformer_main_kernel, nhead=nhead,
                        compute_dtype=compute_dtype),
      grid_spec=grid_spec,
      out_shape=jax.ShapeDtypeStruct((B, out_len), jnp.float32),
      compiler_params=pltpu.CompilerParams(
          # batch tiles are independent (megacore-splittable); layers sequential
          dimension_semantics=("parallel", "arbitrary"),
          vmem_limit_bytes=48 * 1024 * 1024,   # >32 MiB default, < v7x 64 MiB
      ),
  )(x, params["emb_w"], params["emb_b"], pe,
    params["qkv_w"], params["qkv_b"], params["out_w"], params["out_b"],
    params["ln1_g"], params["ln1_b"],
    params["ff1_w"], params["ff1_b"], params["ff2_w"], params["ff2_b"],
    params["ln2_g"], params["ln2_b"],
    params["fc_w"], params["fc_b"])


# --------------------------- parameters / reference --------------------------

def make_positional_encoding(max_len, d_model):
  position = jnp.arange(max_len, dtype=jnp.float32)[:, None]
  div_term = jnp.exp(jnp.arange(0, d_model, 2, dtype=jnp.float32)
                     * (-math.log(10000.0) / d_model))
  pe = jnp.zeros((max_len, d_model), jnp.float32)
  pe = pe.at[:, 0::2].set(jnp.sin(position * div_term))
  pe = pe.at[:, 1::2].set(jnp.cos(position * div_term))
  return pe


def init_torch_params(key, *, input_size, d_model, nhead, num_encoder_layers,
                      dim_feedforward, output_len):
  """Random parameters in PyTorch tensor layouts."""
  del nhead
  keys = iter(jax.random.split(key, 64))

  def nrm(shape, scale=0.1):
    return scale * jax.random.normal(next(keys), shape, dtype=jnp.float32)

  layers = []
  for _ in range(num_encoder_layers):
    layers.append(dict(
        in_proj_weight=nrm((3 * d_model, d_model)),
        in_proj_bias=nrm((3 * d_model,)),
        out_proj_weight=nrm((d_model, d_model)),
        out_proj_bias=nrm((d_model,)),
        norm1_weight=1.0 + nrm((d_model,)),
        norm1_bias=nrm((d_model,)),
        linear1_weight=nrm((dim_feedforward, d_model)),
        linear1_bias=nrm((dim_feedforward,)),
        linear2_weight=nrm((d_model, dim_feedforward)),
        linear2_bias=nrm((d_model,)),
        norm2_weight=1.0 + nrm((d_model,)),
        norm2_bias=nrm((d_model,)),
    ))
  return dict(
      embedding_weight=nrm((d_model, input_size)),
      embedding_bias=nrm((d_model,)),
      layers=layers,
      fc_weight=nrm((output_len, d_model)),
      fc_bias=nrm((output_len,)),
  )


def to_kernel_params(tp, *, nhead, max_len, weight_dtype=jnp.bfloat16):
  """Rearrange PyTorch-layout params into the fused-kernel layout.

  Heavy per-layer weight matrices are stored in `weight_dtype` (bf16 by default)
  to halve the per-layer weight DMA and double-buffer footprint; biases and
  LayerNorm params stay f32 (elementwise math stays f32 in-kernel).
  """
  del nhead  # head ordering is already contiguous in the PyTorch layouts
  D = tp["embedding_weight"].shape[0]

  def stack(fn, dtype=jnp.float32):
    return jnp.stack([fn(lp) for lp in tp["layers"]]).astype(dtype)

  return dict(
      emb_w=tp["embedding_weight"].T,                     # (Cin, D) f32
      emb_b=tp["embedding_bias"].reshape(1, D),
      pe=make_positional_encoding(max_len, D),
      # (L, D, 3D): columns ordered [q heads | k heads | v heads]
      qkv_w=stack(lambda lp: lp["in_proj_weight"].T, weight_dtype),
      qkv_b=stack(lambda lp: lp["in_proj_bias"].reshape(1, 3 * D)),
      # y = concat_heads @ W_out.T  ->  kernel uses W_out.T, (L, D, D)
      out_w=stack(lambda lp: lp["out_proj_weight"].T, weight_dtype),
      out_b=stack(lambda lp: lp["out_proj_bias"].reshape(1, D)),
      ln1_g=stack(lambda lp: lp["norm1_weight"].reshape(1, D)),
      ln1_b=stack(lambda lp: lp["norm1_bias"].reshape(1, D)),
      ff1_w=stack(lambda lp: lp["linear1_weight"].T, weight_dtype),  # (L, D, F)
      ff1_b=stack(lambda lp: lp["linear1_bias"].reshape(1, -1)),
      ff2_w=stack(lambda lp: lp["linear2_weight"].T, weight_dtype),  # (L, F, D)
      ff2_b=stack(lambda lp: lp["linear2_bias"].reshape(1, D)),
      ln2_g=stack(lambda lp: lp["norm2_weight"].reshape(1, D)),
      ln2_b=stack(lambda lp: lp["norm2_bias"].reshape(1, D)),
      fc_w=tp["fc_weight"].T,                             # (D, O) f32
      fc_b=tp["fc_bias"].reshape(1, -1),
  )


def reference_forward(x, tp, *, nhead):
  """Pure-JAX reference of TransformerMain.forward (eval mode, f32)."""
  D = tp["embedding_weight"].shape[0]
  B, T, _ = x.shape
  dh = D // nhead

  def ln(v, g, b):
    mu = jnp.mean(v, axis=-1, keepdims=True)
    var = jnp.mean((v - mu) ** 2, axis=-1, keepdims=True)
    return (v - mu) * jax.lax.rsqrt(var + 1e-5) * g + b

  h = x @ tp["embedding_weight"].T + tp["embedding_bias"]
  h = h + make_positional_encoding(T, D)
  for lp in tp["layers"]:
    qkv = h @ lp["in_proj_weight"].T + lp["in_proj_bias"]
    q, k, v = jnp.split(qkv, 3, axis=-1)

    def heads(a):
      return a.reshape(B, T, nhead, dh).transpose(0, 2, 1, 3)

    qh, kh, vh = heads(q), heads(k), heads(v)
    s = jnp.einsum("bhqd,bhkd->bhqk", qh, kh) / math.sqrt(dh)
    w = jax.nn.softmax(s, axis=-1)
    o = jnp.einsum("bhqk,bhkd->bhqd", w, vh)
    o = o.transpose(0, 2, 1, 3).reshape(B, T, D)
    attn = o @ lp["out_proj_weight"].T + lp["out_proj_bias"]
    h = ln(h + attn, lp["norm1_weight"], lp["norm1_bias"])
    ff = jax.nn.relu(h @ lp["linear1_weight"].T + lp["linear1_bias"])
    ff = ff @ lp["linear2_weight"].T + lp["linear2_bias"]
    h = ln(h + ff, lp["norm2_weight"], lp["norm2_bias"])
  last = h[:, -1, :]
  return last @ tp["fc_weight"].T + tp["fc_bias"]


# ---------------------------------- main -------------------------------------

if __name__ == "__main__":
  cfg = dict(input_size=8, d_model=32, nhead=4, num_encoder_layers=2,
             dim_feedforward=64, output_len=4)
  B, T = 2, 16

  key = jax.random.PRNGKey(0)
  pkey, xkey = jax.random.split(key)
  tp = init_torch_params(pkey, **cfg)
  kp = to_kernel_params(tp, nhead=cfg["nhead"], max_len=64)
  x = jax.random.normal(xkey, (B, T, cfg["input_size"]), dtype=jnp.float32)

  fwd = jax.jit(functools.partial(transformer_main_forward, params=kp,
                                  nhead=cfg["nhead"],
                                  compute_dtype=jnp.bfloat16))
  out = jax.block_until_ready(fwd(x))
  assert out.shape == (B, cfg["output_len"]), out.shape

  # Sanity check vs. a pure-JAX reference of the PyTorch forward (loose tolerance
  # to absorb the intended bf16-operand MXU math).
  ref = reference_forward(x, tp, nhead=cfg["nhead"])
  if not bool(jnp.allclose(out, ref, atol=7.5e-2, rtol=7.5e-2)):
    max_err = float(jnp.max(jnp.abs(out - ref)))
    raise AssertionError(f"kernel output mismatch, max abs err = {max_err}")

  print("KERNEL_OK")
</pallas_src>

<mosaic_0001>
module attributes {stable_mosaic.version = 11 : i64} {
  func.func @_transformer_main_kernel(%arg0: i32, %arg1: i32, %arg2: memref<2x16x8xf32, #tpu.memory_space<vmem>>, %arg3: memref<8x32xf32, #tpu.memory_space<vmem>>, %arg4: memref<1x32xf32, #tpu.memory_space<vmem>>, %arg5: memref<16x32xf32, #tpu.memory_space<vmem>>, %arg6: memref<1x32x96xbf16, #tpu.memory_space<vmem>>, %arg7: memref<1x1x96xf32, #tpu.memory_space<vmem>>, %arg8: memref<1x32x32xbf16, #tpu.memory_space<vmem>>, %arg9: memref<1x1x32xf32, #tpu.memory_space<vmem>>, %arg10: memref<1x1x32xf32, #tpu.memory_space<vmem>>, %arg11: memref<1x1x32xf32, #tpu.memory_space<vmem>>, %arg12: memref<1x32x64xbf16, #tpu.memory_space<vmem>>, %arg13: memref<1x1x64xf32, #tpu.memory_space<vmem>>, %arg14: memref<1x64x32xbf16, #tpu.memory_space<vmem>>, %arg15: memref<1x1x32xf32, #tpu.memory_space<vmem>>, %arg16: memref<1x1x32xf32, #tpu.memory_space<vmem>>, %arg17: memref<1x1x32xf32, #tpu.memory_space<vmem>>, %arg18: memref<32x4xf32, #tpu.memory_space<vmem>>, %arg19: memref<1x4xf32, #tpu.memory_space<vmem>>, %arg20: memref<2x4xf32, #tpu.memory_space<vmem>>, %arg21: memref<32x32xf32, #tpu.memory_space<vmem>>) attributes {dimension_semantics = [#tpu.dimension_semantics<parallel>, #tpu.dimension_semantics<arbitrary>], iteration_bounds = array<i64: 1, 2>, scalar_prefetch = 0 : i64, scratch_operands = 1 : i64, tpu.core_type = #tpu.core_type<tc>, window_params = [{transform_indices = @transform_0, window_bounds = array<i64: 2, 16, 8>}, {pipeline_mode = #tpu.pipeline_mode<synchronous>, transform_indices = @transform_1, window_bounds = array<i64: 8, 32>}, {pipeline_mode = #tpu.pipeline_mode<synchronous>, transform_indices = @transform_2, window_bounds = array<i64: 1, 32>}, {pipeline_mode = #tpu.pipeline_mode<synchronous>, transform_indices = @transform_3, window_bounds = array<i64: 16, 32>}, {transform_indices = @transform_4, window_bounds = array<i64: 1, 32, 96>}, {transform_indices = @transform_5, window_bounds = array<i64: 1, 1, 96>}, {transform_indices = @transform_6, window_bounds = array<i64: 1, 32, 32>}, {transform_indices = @transform_7, window_bounds = array<i64: 1, 1, 32>}, {transform_indices = @transform_8, window_bounds = array<i64: 1, 1, 32>}, {transform_indices = @transform_9, window_bounds = array<i64: 1, 1, 32>}, {transform_indices = @transform_10, window_bounds = array<i64: 1, 32, 64>}, {transform_indices = @transform_11, window_bounds = array<i64: 1, 1, 64>}, {transform_indices = @transform_12, window_bounds = array<i64: 1, 64, 32>}, {transform_indices = @transform_13, window_bounds = array<i64: 1, 1, 32>}, {transform_indices = @transform_14, window_bounds = array<i64: 1, 1, 32>}, {transform_indices = @transform_15, window_bounds = array<i64: 1, 1, 32>}, {pipeline_mode = #tpu.pipeline_mode<synchronous>, transform_indices = @transform_16, window_bounds = array<i64: 32, 4>}, {pipeline_mode = #tpu.pipeline_mode<synchronous>, transform_indices = @transform_17, window_bounds = array<i64: 1, 4>}, {transform_indices = @transform_18, window_bounds = array<i64: 2, 4>}]} {
    %c0_i32 = arith.constant 0 : i32
    %0 = arith.cmpi eq, %arg1, %c0_i32 : i32
    %1 = arith.extui %0 : i1 to i32
    %c0_i32_0 = arith.constant 0 : i32
    %2 = arith.cmpi ne, %1, %c0_i32_0 : i32
    scf.if %2 {
      %c0_75 = arith.constant 0 : index
      %c0_76 = arith.constant 0 : index
      %c0_77 = arith.constant 0 : index
      %189 = vector.load %arg2[%c0_75, %c0_76, %c0_77] : memref<2x16x8xf32, #tpu.memory_space<vmem>>, vector<2x16x8xf32>
      %190 = vector.shape_cast %189 : vector<2x16x8xf32> to vector<32x8xf32>
      %191 = arith.truncf %190 : vector<32x8xf32> to vector<32x8xbf16>
      %c0_78 = arith.constant 0 : index
      %c0_79 = arith.constant 0 : index
      %192 = vector.load %arg3[%c0_78, %c0_79] : memref<8x32xf32, #tpu.memory_space<vmem>>, vector<8x32xf32>
      %193 = arith.truncf %192 : vector<8x32xf32> to vector<8x32xbf16>
      %cst_80 = arith.constant dense<0.000000e+00> : vector<32x32xf32>
      %194 = tpu.matmul %191, %193, %cst_80 {dimension_numbers = #tpu.dot_dimension_numbers<[1], [0], [0], [1], [0, 0, 1, 1], [], []>} : vector<32x8xbf16>, vector<8x32xbf16>, vector<32x32xf32> -> vector<32x32xf32>
      %c0_81 = arith.constant 0 : index
      %c0_82 = arith.constant 0 : index
      %195 = vector.load %arg4[%c0_81, %c0_82] : memref<1x32xf32, #tpu.memory_space<vmem>>, vector<1x32xf32>
      %196 = vector.broadcast %195 : vector<1x32xf32> to vector<32x32xf32>
      %197 = arith.addf %194, %196 : vector<32x32xf32>
      %198 = vector.shape_cast %197 : vector<32x32xf32> to vector<2x16x32xf32>
      %c0_83 = arith.constant 0 : index
      %c0_84 = arith.constant 0 : index
      %199 = vector.load %arg5[%c0_83, %c0_84] : memref<16x32xf32, #tpu.memory_space<vmem>>, vector<16x32xf32>
      %200 = vector.shape_cast %199 : vector<16x32xf32> to vector<1x16x32xf32>
      %201 = vector.broadcast %200 : vector<1x16x32xf32> to vector<2x16x32xf32>
      %202 = arith.addf %198, %201 : vector<2x16x32xf32>
      %203 = vector.shape_cast %202 : vector<2x16x32xf32> to vector<32x32xf32>
      %c0_85 = arith.constant 0 : index
      %c0_86 = arith.constant 0 : index
      %204 = vector.load %arg21[%c0_85, %c0_86] : memref<32x32xf32, #tpu.memory_space<vmem>>, vector<32x32xf32>
      tpu.vector_store %arg21[%c0_85, %c0_86], %203 {strides = array<i32>} : memref<32x32xf32, #tpu.memory_space<vmem>>, vector<32x32xf32>,
    } else {
    }
    %c0 = arith.constant 0 : index
    %c0_1 = arith.constant 0 : index
    %3 = vector.load %arg21[%c0, %c0_1] : memref<32x32xf32, #tpu.memory_space<vmem>>, vector<32x32xf32>
    %4 = arith.truncf %3 : vector<32x32xf32> to vector<32x32xbf16>
    %c0_2 = arith.constant 0 : index
    %c0_3 = arith.constant 0 : index
    %c0_4 = arith.constant 0 : index
    %5 = vector.load %arg6[%c0_2, %c0_3, %c0_4] : memref<1x32x96xbf16, #tpu.memory_space<vmem>>, vector<1x32x96xbf16>
    %6 = vector.shape_cast %5 : vector<1x32x96xbf16> to vector<32x96xbf16>
    %cst = arith.constant dense<0.000000e+00> : vector<32x96xf32>
    %7 = tpu.matmul %4, %6, %cst {dimension_numbers = #tpu.dot_dimension_numbers<[1], [0], [0], [1], [0, 0, 1, 1], [], []>} : vector<32x32xbf16>, vector<32x96xbf16>, vector<32x96xf32> -> vector<32x96xf32>
    %c0_5 = arith.constant 0 : index
    %c0_6 = arith.constant 0 : index
    %c0_7 = arith.constant 0 : index
    %8 = vector.load %arg7[%c0_5, %c0_6, %c0_7] : memref<1x1x96xf32, #tpu.memory_space<vmem>>, vector<1x1x96xf32>
    %9 = vector.shape_cast %8 : vector<1x1x96xf32> to vector<1x96xf32>
    %10 = vector.broadcast %9 : vector<1x96xf32> to vector<32x96xf32>
    %11 = arith.addf %7, %10 : vector<32x96xf32>
    %12 = vector.extract_strided_slice %11 {offsets = [0, 0], sizes = [32, 8], strides = [1, 1]} : vector<32x96xf32> to vector<32x8xf32>
    %cst_8 = arith.constant 0.353553385 : f32
    %13 = vector.broadcast %cst_8 : f32 to vector<32x8xf32>
    %14 = arith.mulf %12, %13 : vector<32x8xf32>
    %15 = vector.extract_strided_slice %11 {offsets = [0, 32], sizes = [32, 8], strides = [1, 1]} : vector<32x96xf32> to vector<32x8xf32>
    %16 = vector.extract_strided_slice %11 {offsets = [0, 64], sizes = [32, 8], strides = [1, 1]} : vector<32x96xf32> to vector<32x8xf32>
    %17 = vector.shape_cast %14 : vector<32x8xf32> to vector<2x16x8xf32>
    %18 = arith.truncf %17 : vector<2x16x8xf32> to vector<2x16x8xbf16>
    %19 = vector.shape_cast %15 : vector<32x8xf32> to vector<2x16x8xf32>
    %20 = arith.truncf %19 : vector<2x16x8xf32> to vector<2x16x8xbf16>
    %21 = vector.shape_cast %16 : vector<32x8xf32> to vector<2x16x8xf32>
    %22 = arith.truncf %21 : vector<2x16x8xf32> to vector<2x16x8xbf16>
    "tpu.trace_start"() <{level = 10 : i32, message = "bqd,bkd->bqk"}> : () -> ()
    %cst_9 = arith.constant dense<0.000000e+00> : vector<2x16x16xf32>
    %23 = tpu.matmul %18, %20, %cst_9 {dimension_numbers = #tpu.dot_dimension_numbers<[2], [2], [1], [1], [0, 0, 0, 1, 1, 1], [0], [0]>} : vector<2x16x8xbf16>, vector<2x16x8xbf16>, vector<2x16x16xf32> -> vector<2x16x16xf32>
    "tpu.trace_stop"() : () -> ()
    %cst_10 = arith.constant dense<0xFF800000> : vector<2x16xf32>
    %24 = vector.multi_reduction <maximumf>, %23, %cst_10 [2] : vector<2x16x16xf32> to vector<2x16xf32>
    %25 = vector.shape_cast %24 : vector<2x16xf32> to vector<2x16x1xf32>
    %26 = vector.broadcast %25 : vector<2x16x1xf32> to vector<2x16x16xf32>
    %27 = arith.subf %23, %26 : vector<2x16x16xf32>
    %28 = math.exp %27 : vector<2x16x16xf32>
    %cst_11 = arith.constant dense<0.000000e+00> : vector<2x16xf32>
    %29 = vector.multi_reduction <add>, %28, %cst_11 [2] : vector<2x16x16xf32> to vector<2x16xf32>
    %30 = vector.shape_cast %29 : vector<2x16xf32> to vector<2x16x1xf32>
    %31 = vector.broadcast %30 : vector<2x16x1xf32> to vector<2x16x16xf32>
    %32 = arith.divf %28, %31 : vector<2x16x16xf32>
    %33 = arith.truncf %32 : vector<2x16x16xf32> to vector<2x16x16xbf16>
    "tpu.trace_start"() <{level = 10 : i32, message = "bqk,bkd->bqd"}> : () -> ()
    %cst_12 = arith.constant dense<0.000000e+00> : vector<2x16x8xf32>
    %34 = tpu.matmul %33, %22, %cst_12 {dimension_numbers = #tpu.dot_dimension_numbers<[2], [1], [1], [2], [0, 0, 0, 1, 1, 2], [0], [0]>} : vector<2x16x16xbf16>, vector<2x16x8xbf16>, vector<2x16x8xf32> -> vector<2x16x8xf32>
    "tpu.trace_stop"() : () -> ()
    %35 = vector.shape_cast %34 : vector<2x16x8xf32> to vector<32x8xf32>
    %36 = vector.extract_strided_slice %11 {offsets = [0, 8], sizes = [32, 8], strides = [1, 1]} : vector<32x96xf32> to vector<32x8xf32>
    %cst_13 = arith.constant 0.353553385 : f32
    %37 = vector.broadcast %cst_13 : f32 to vector<32x8xf32>
    %38 = arith.mulf %36, %37 : vector<32x8xf32>
    %39 = vector.extract_strided_slice %11 {offsets = [0, 40], sizes = [32, 8], strides = [1, 1]} : vector<32x96xf32> to vector<32x8xf32>
    %40 = vector.extract_strided_slice %11 {offsets = [0, 72], sizes = [32, 8], strides = [1, 1]} : vector<32x96xf32> to vector<32x8xf32>
    %41 = vector.shape_cast %38 : vector<32x8xf32> to vector<2x16x8xf32>
    %42 = arith.truncf %41 : vector<2x16x8xf32> to vector<2x16x8xbf16>
    %43 = vector.shape_cast %39 : vector<32x8xf32> to vector<2x16x8xf32>
    %44 = arith.truncf %43 : vector<2x16x8xf32> to vector<2x16x8xbf16>
    %45 = vector.shape_cast %40 : vector<32x8xf32> to vector<2x16x8xf32>
    %46 = arith.truncf %45 : vector<2x16x8xf32> to vector<2x16x8xbf16>
    "tpu.trace_start"() <{level = 10 : i32, message = "bqd,bkd->bqk"}> : () -> ()
    %cst_14 = arith.constant dense<0.000000e+00> : vector<2x16x16xf32>
    %47 = tpu.matmul %42, %44, %cst_14 {dimension_numbers = #tpu.dot_dimension_numbers<[2], [2], [1], [1], [0, 0, 0, 1, 1, 1], [0], [0]>} : vector<2x16x8xbf16>, vector<2x16x8xbf16>, vector<2x16x16xf32> -> vector<2x16x16xf32>
    "tpu.trace_stop"() : () -> ()
    %cst_15 = arith.constant dense<0xFF800000> : vector<2x16xf32>
    %48 = vector.multi_reduction <maximumf>, %47, %cst_15 [2] : vector<2x16x16xf32> to vector<2x16xf32>
    %49 = vector.shape_cast %48 : vector<2x16xf32> to vector<2x16x1xf32>
    %50 = vector.broadcast %49 : vector<2x16x1xf32> to vector<2x16x16xf32>
    %51 = arith.subf %47, %50 : vector<2x16x16xf32>
    %52 = math.exp %51 : vector<2x16x16xf32>
    %cst_16 = arith.constant dense<0.000000e+00> : vector<2x16xf32>
    %53 = vector.multi_reduction <add>, %52, %cst_16 [2] : vector<2x16x16xf32> to vector<2x16xf32>
    %54 = vector.shape_cast %53 : vector<2x16xf32> to vector<2x16x1xf32>
    %55 = vector.broadcast %54 : vector<2x16x1xf32> to vector<2x16x16xf32>
    %56 = arith.divf %52, %55 : vector<2x16x16xf32>
    %57 = arith.truncf %56 : vector<2x16x16xf32> to vector<2x16x16xbf16>
    "tpu.trace_start"() <{level = 10 : i32, message = "bqk,bkd->bqd"}> : () -> ()
    %cst_17 = arith.constant dense<0.000000e+00> : vector<2x16x8xf32>
    %58 = tpu.matmul %57, %46, %cst_17 {dimension_numbers = #tpu.dot_dimension_numbers<[2], [1], [1], [2], [0, 0, 0, 1, 1, 2], [0], [0]>} : vector<2x16x16xbf16>, vector<2x16x8xbf16>, vector<2x16x8xf32> -> vector<2x16x8xf32>
    "tpu.trace_stop"() : () -> ()
    %59 = vector.shape_cast %58 : vector<2x16x8xf32> to vector<32x8xf32>
    %60 = vector.extract_strided_slice %11 {offsets = [0, 16], sizes = [32, 8], strides = [1, 1]} : vector<32x96xf32> to vector<32x8xf32>
    %cst_18 = arith.constant 0.353553385 : f32
    %61 = vector.broadcast %cst_18 : f32 to vector<32x8xf32>
    %62 = arith.mulf %60, %61 : vector<32x8xf32>
    %63 = vector.extract_strided_slice %11 {offsets = [0, 48], sizes = [32, 8], strides = [1, 1]} : vector<32x96xf32> to vector<32x8xf32>
    %64 = vector.extract_strided_slice %11 {offsets = [0, 80], sizes = [32, 8], strides = [1, 1]} : vector<32x96xf32> to vector<32x8xf32>
    %65 = vector.shape_cast %62 : vector<32x8xf32> to vector<2x16x8xf32>
    %66 = arith.truncf %65 : vector<2x16x8xf32> to vector<2x16x8xbf16>
    %67 = vector.shape_cast %63 : vector<32x8xf32> to vector<2x16x8xf32>
    %68 = arith.truncf %67 : vector<2x16x8xf32> to vector<2x16x8xbf16>
    %69 = vector.shape_cast %64 : vector<32x8xf32> to vector<2x16x8xf32>
    %70 = arith.truncf %69 : vector<2x16x8xf32> to vector<2x16x8xbf16>
    "tpu.trace_start"() <{level = 10 : i32, message = "bqd,bkd->bqk"}> : () -> ()
    %cst_19 = arith.constant dense<0.000000e+00> : vector<2x16x16xf32>
    %71 = tpu.matmul %66, %68, %cst_19 {dimension_numbers = #tpu.dot_dimension_numbers<[2], [2], [1], [1], [0, 0, 0, 1, 1, 1], [0], [0]>} : vector<2x16x8xbf16>, vector<2x16x8xbf16>, vector<2x16x16xf32> -> vector<2x16x16xf32>
    "tpu.trace_stop"() : () -> ()
    %cst_20 = arith.constant dense<0xFF800000> : vector<2x16xf32>
    %72 = vector.multi_reduction <maximumf>, %71, %cst_20 [2] : vector<2x16x16xf32> to vector<2x16xf32>
    %73 = vector.shape_cast %72 : vector<2x16xf32> to vector<2x16x1xf32>
    %74 = vector.broadcast %73 : vector<2x16x1xf32> to vector<2x16x16xf32>
    %75 = arith.subf %71, %74 : vector<2x16x16xf32>
    %76 = math.exp %75 : vector<2x16x16xf32>
    %cst_21 = arith.constant dense<0.000000e+00> : vector<2x16xf32>
    %77 = vector.multi_reduction <add>, %76, %cst_21 [2] : vector<2x16x16xf32> to vector<2x16xf32>
    %78 = vector.shape_cast %77 : vector<2x16xf32> to vector<2x16x1xf32>
    %79 = vector.broadcast %78 : vector<2x16x1xf32> to vector<2x16x16xf32>
    %80 = arith.divf %76, %79 : vector<2x16x16xf32>
    %81 = arith.truncf %80 : vector<2x16x16xf32> to vector<2x16x16xbf16>
    "tpu.trace_start"() <{level = 10 : i32, message = "bqk,bkd->bqd"}> : () -> ()
    %cst_22 = arith.constant dense<0.000000e+00> : vector<2x16x8xf32>
    %82 = tpu.matmul %81, %70, %cst_22 {dimension_numbers = #tpu.dot_dimension_numbers<[2], [1], [1], [2], [0, 0, 0, 1, 1, 2], [0], [0]>} : vector<2x16x16xbf16>, vector<2x16x8xbf16>, vector<2x16x8xf32> -> vector<2x16x8xf32>
    "tpu.trace_stop"() : () -> ()
    %83 = vector.shape_cast %82 : vector<2x16x8xf32> to vector<32x8xf32>
    %84 = vector.extract_strided_slice %11 {offsets = [0, 24], sizes = [32, 8], strides = [1, 1]} : vector<32x96xf32> to vector<32x8xf32>
    %cst_23 = arith.constant 0.353553385 : f32
    %85 = vector.broadcast %cst_23 : f32 to vector<32x8xf32>
    %86 = arith.mulf %84, %85 : vector<32x8xf32>
    %87 = vector.extract_strided_slice %11 {offsets = [0, 56], sizes = [32, 8], strides = [1, 1]} : vector<32x96xf32> to vector<32x8xf32>
    %88 = vector.extract_strided_slice %11 {offsets = [0, 88], sizes = [32, 8], strides = [1, 1]} : vector<32x96xf32> to vector<32x8xf32>
    %89 = vector.shape_cast %86 : vector<32x8xf32> to vector<2x16x8xf32>
    %90 = arith.truncf %89 : vector<2x16x8xf32> to vector<2x16x8xbf16>
    %91 = vector.shape_cast %87 : vector<32x8xf32> to vector<2x16x8xf32>
    %92 = arith.truncf %91 : vector<2x16x8xf32> to vector<2x16x8xbf16>
    %93 = vector.shape_cast %88 : vector<32x8xf32> to vector<2x16x8xf32>
    %94 = arith.truncf %93 : vector<2x16x8xf32> to vector<2x16x8xbf16>
    "tpu.trace_start"() <{level = 10 : i32, message = "bqd,bkd->bqk"}> : () -> ()
    %cst_24 = arith.constant dense<0.000000e+00> : vector<2x16x16xf32>
    %95 = tpu.matmul %90, %92, %cst_24 {dimension_numbers = #tpu.dot_dimension_numbers<[2], [2], [1], [1], [0, 0, 0, 1, 1, 1], [0], [0]>} : vector<2x16x8xbf16>, vector<2x16x8xbf16>, vector<2x16x16xf32> -> vector<2x16x16xf32>
    "tpu.trace_stop"() : () -> ()
    %cst_25 = arith.constant dense<0xFF800000> : vector<2x16xf32>
    %96 = vector.multi_reduction <maximumf>, %95, %cst_25 [2] : vector<2x16x16xf32> to vector<2x16xf32>
    %97 = vector.shape_cast %96 : vector<2x16xf32> to vector<2x16x1xf32>
    %98 = vector.broadcast %97 : vector<2x16x1xf32> to vector<2x16x16xf32>
    %99 = arith.subf %95, %98 : vector<2x16x16xf32>
    %100 = math.exp %99 : vector<2x16x16xf32>
    %cst_26 = arith.constant dense<0.000000e+00> : vector<2x16xf32>
    %101 = vector.multi_reduction <add>, %100, %cst_26 [2] : vector<2x16x16xf32> to vector<2x16xf32>
    %102 = vector.shape_cast %101 : vector<2x16xf32> to vector<2x16x1xf32>
    %103 = vector.broadcast %102 : vector<2x16x1xf32> to vector<2x16x16xf32>
    %104 = arith.divf %100, %103 : vector<2x16x16xf32>
    %105 = arith.truncf %104 : vector<2x16x16xf32> to vector<2x16x16xbf16>
    "tpu.trace_start"() <{level = 10 : i32, message = "bqk,bkd->bqd"}> : () -> ()
    %cst_27 = arith.constant dense<0.000000e+00> : vector<2x16x8xf32>
    %106 = tpu.matmul %105, %94, %cst_27 {dimension_numbers = #tpu.dot_dimension_numbers<[2], [1], [1], [2], [0, 0, 0, 1, 1, 2], [0], [0]>} : vector<2x16x16xbf16>, vector<2x16x8xbf16>, vector<2x16x8xf32> -> vector<2x16x8xf32>
    "tpu.trace_stop"() : () -> ()
    %107 = vector.shape_cast %106 : vector<2x16x8xf32> to vector<32x8xf32>
    %108 = tpu.concatenate %35, %59, %83, %107 in 1 : vector<32x8xf32>, vector<32x8xf32>, vector<32x8xf32>, vector<32x8xf32> -> vector<32x32xf32>
    %109 = arith.truncf %108 : vector<32x32xf32> to vector<32x32xbf16>
    %c0_28 = arith.constant 0 : index
    %c0_29 = arith.constant 0 : index
    %c0_30 = arith.constant 0 : index
    %110 = vector.load %arg8[%c0_28, %c0_29, %c0_30] : memref<1x32x32xbf16, #tpu.memory_space<vmem>>, vector<1x32x32xbf16>
    %111 = vector.shape_cast %110 : vector<1x32x32xbf16> to vector<32x32xbf16>
    %cst_31 = arith.constant dense<0.000000e+00> : vector<32x32xf32>
    %112 = tpu.matmul %109, %111, %cst_31 {dimension_numbers = #tpu.dot_dimension_numbers<[1], [0], [0], [1], [0, 0, 1, 1], [], []>} : vector<32x32xbf16>, vector<32x32xbf16>, vector<32x32xf32> -> vector<32x32xf32>
    %c0_32 = arith.constant 0 : index
    %c0_33 = arith.constant 0 : index
    %c0_34 = arith.constant 0 : index
    %113 = vector.load %arg9[%c0_32, %c0_33, %c0_34] : memref<1x1x32xf32, #tpu.memory_space<vmem>>, vector<1x1x32xf32>
    %114 = vector.shape_cast %113 : vector<1x1x32xf32> to vector<1x32xf32>
    %115 = vector.broadcast %114 : vector<1x32xf32> to vector<32x32xf32>
    %116 = arith.addf %112, %115 : vector<32x32xf32>
    %117 = arith.addf %3, %116 : vector<32x32xf32>
    %c0_35 = arith.constant 0 : index
    %c0_36 = arith.constant 0 : index
    %c0_37 = arith.constant 0 : index
    %118 = vector.load %arg10[%c0_35, %c0_36, %c0_37] : memref<1x1x32xf32, #tpu.memory_space<vmem>>, vector<1x1x32xf32>
    %119 = vector.shape_cast %118 : vector<1x1x32xf32> to vector<1x32xf32>
    %c0_38 = arith.constant 0 : index
    %c0_39 = arith.constant 0 : index
    %c0_40 = arith.constant 0 : index
    %120 = vector.load %arg11[%c0_38, %c0_39, %c0_40] : memref<1x1x32xf32, #tpu.memory_space<vmem>>, vector<1x1x32xf32>
    %121 = vector.shape_cast %120 : vector<1x1x32xf32> to vector<1x32xf32>
    %cst_41 = arith.constant dense<0.000000e+00> : vector<32xf32>
    %122 = vector.multi_reduction <add>, %117, %cst_41 [1] : vector<32x32xf32> to vector<32xf32>
    %123 = vector.shape_cast %122 : vector<32xf32> to vector<32x1xf32>
    %cst_42 = arith.constant 3.200000e+01 : f32
    %124 = vector.broadcast %cst_42 : f32 to vector<32x1xf32>
    %125 = arith.divf %123, %124 : vector<32x1xf32>
    %126 = vector.broadcast %125 : vector<32x1xf32> to vector<32x32xf32>
    %127 = arith.subf %117, %126 : vector<32x32xf32>
    %128 = arith.mulf %127, %127 : vector<32x32xf32>
    %cst_43 = arith.constant dense<0.000000e+00> : vector<32xf32>
    %129 = vector.multi_reduction <add>, %128, %cst_43 [1] : vector<32x32xf32> to vector<32xf32>
    %130 = vector.shape_cast %129 : vector<32xf32> to vector<32x1xf32>
    %cst_44 = arith.constant 3.200000e+01 : f32
    %131 = vector.broadcast %cst_44 : f32 to vector<32x1xf32>
    %132 = arith.divf %130, %131 : vector<32x1xf32>
    %cst_45 = arith.constant 9.99999974E-6 : f32
    %133 = vector.broadcast %cst_45 : f32 to vector<32x1xf32>
    %134 = arith.addf %132, %133 : vector<32x1xf32>
    %135 = math.rsqrt %134 : vector<32x1xf32>
    %136 = vector.broadcast %135 : vector<32x1xf32> to vector<32x32xf32>
    %137 = arith.mulf %127, %136 : vector<32x32xf32>
    %138 = vector.broadcast %119 : vector<1x32xf32> to vector<32x32xf32>
    %139 = arith.mulf %137, %138 : vector<32x32xf32>
    %140 = vector.broadcast %121 : vector<1x32xf32> to vector<32x32xf32>
    %141 = arith.addf %139, %140 : vector<32x32xf32>
    %142 = arith.truncf %141 : vector<32x32xf32> to vector<32x32xbf16>
    %c0_46 = arith.constant 0 : index
    %c0_47 = arith.constant 0 : index
    %c0_48 = arith.constant 0 : index
    %143 = vector.load %arg12[%c0_46, %c0_47, %c0_48] : memref<1x32x64xbf16, #tpu.memory_space<vmem>>, vector<1x32x64xbf16>
    %144 = vector.shape_cast %143 : vector<1x32x64xbf16> to vector<32x64xbf16>
    %cst_49 = arith.constant dense<0.000000e+00> : vector<32x64xf32>
    %145 = tpu.matmul %142, %144, %cst_49 {dimension_numbers = #tpu.dot_dimension_numbers<[1], [0], [0], [1], [0, 0, 1, 1], [], []>} : vector<32x32xbf16>, vector<32x64xbf16>, vector<32x64xf32> -> vector<32x64xf32>
    %c0_50 = arith.constant 0 : index
    %c0_51 = arith.constant 0 : index
    %c0_52 = arith.constant 0 : index
    %146 = vector.load %arg13[%c0_50, %c0_51, %c0_52] : memref<1x1x64xf32, #tpu.memory_space<vmem>>, vector<1x1x64xf32>
    %147 = vector.shape_cast %146 : vector<1x1x64xf32> to vector<1x64xf32>
    %148 = vector.broadcast %147 : vector<1x64xf32> to vector<32x64xf32>
    %149 = arith.addf %145, %148 : vector<32x64xf32>
    %cst_53 = arith.constant 0.000000e+00 : f32
    %150 = vector.broadcast %cst_53 : f32 to vector<32x64xf32>
    %151 = arith.maximumf %149, %150 : vector<32x64xf32>
    %152 = arith.truncf %151 : vector<32x64xf32> to vector<32x64xbf16>
    %c0_54 = arith.constant 0 : index
    %c0_55 = arith.constant 0 : index
    %c0_56 = arith.constant 0 : index
    %153 = vector.load %arg14[%c0_54, %c0_55, %c0_56] : memref<1x64x32xbf16, #tpu.memory_space<vmem>>, vector<1x64x32xbf16>
    %154 = vector.shape_cast %153 : vector<1x64x32xbf16> to vector<64x32xbf16>
    %cst_57 = arith.constant dense<0.000000e+00> : vector<32x32xf32>
    %155 = tpu.matmul %152, %154, %cst_57 {dimension_numbers = #tpu.dot_dimension_numbers<[1], [0], [0], [1], [0, 0, 1, 1], [], []>} : vector<32x64xbf16>, vector<64x32xbf16>, vector<32x32xf32> -> vector<32x32xf32>
    %c0_58 = arith.constant 0 : index
    %c0_59 = arith.constant 0 : index
    %c0_60 = arith.constant 0 : index
    %156 = vector.load %arg15[%c0_58, %c0_59, %c0_60] : memref<1x1x32xf32, #tpu.memory_space<vmem>>, vector<1x1x32xf32>
    %157 = vector.shape_cast %156 : vector<1x1x32xf32> to vector<1x32xf32>
    %158 = vector.broadcast %157 : vector<1x32xf32> to vector<32x32xf32>
    %159 = arith.addf %155, %158 : vector<32x32xf32>
    %160 = arith.addf %141, %159 : vector<32x32xf32>
    %c0_61 = arith.constant 0 : index
    %c0_62 = arith.constant 0 : index
    %c0_63 = arith.constant 0 : index
    %161 = vector.load %arg16[%c0_61, %c0_62, %c0_63] : memref<1x1x32xf32, #tpu.memory_space<vmem>>, vector<1x1x32xf32>
    %162 = vector.shape_cast %161 : vector<1x1x32xf32> to vector<1x32xf32>
    %c0_64 = arith.constant 0 : index
    %c0_65 = arith.constant 0 : index
    %c0_66 = arith.constant 0 : index
    %163 = vector.load %arg17[%c0_64, %c0_65, %c0_66] : memref<1x1x32xf32, #tpu.memory_space<vmem>>, vector<1x1x32xf32>
    %164 = vector.shape_cast %163 : vector<1x1x32xf32> to vector<1x32xf32>
    %cst_67 = arith.constant dense<0.000000e+00> : vector<32xf32>
    %165 = vector.multi_reduction <add>, %160, %cst_67 [1] : vector<32x32xf32> to vector<32xf32>
    %166 = vector.shape_cast %165 : vector<32xf32> to vector<32x1xf32>
    %cst_68 = arith.constant 3.200000e+01 : f32
    %167 = vector.broadcast %cst_68 : f32 to vector<32x1xf32>
    %168 = arith.divf %166, %167 : vector<32x1xf32>
    %169 = vector.broadcast %168 : vector<32x1xf32> to vector<32x32xf32>
    %170 = arith.subf %160, %169 : vector<32x32xf32>
    %171 = arith.mulf %170, %170 : vector<32x32xf32>
    %cst_69 = arith.constant dense<0.000000e+00> : vector<32xf32>
    %172 = vector.multi_reduction <add>, %171, %cst_69 [1] : vector<32x32xf32> to vector<32xf32>
    %173 = vector.shape_cast %172 : vector<32xf32> to vector<32x1xf32>
    %cst_70 = arith.constant 3.200000e+01 : f32
    %174 = vector.broadcast %cst_70 : f32 to vector<32x1xf32>
    %175 = arith.divf %173, %174 : vector<32x1xf32>
    %cst_71 = arith.constant 9.99999974E-6 : f32
    %176 = vector.broadcast %cst_71 : f32 to vector<32x1xf32>
    %177 = arith.addf %175, %176 : vector<32x1xf32>
    %178 = math.rsqrt %177 : vector<32x1xf32>
    %179 = vector.broadcast %178 : vector<32x1xf32> to vector<32x32xf32>
    %180 = arith.mulf %170, %179 : vector<32x32xf32>
    %181 = vector.broadcast %162 : vector<1x32xf32> to vector<32x32xf32>
    %182 = arith.mulf %180, %181 : vector<32x32xf32>
    %183 = vector.broadcast %164 : vector<1x32xf32> to vector<32x32xf32>
    %184 = arith.addf %182, %183 : vector<32x32xf32>
    %c0_72 = arith.constant 0 : index
    %c0_73 = arith.constant 0 : index
    %185 = vector.load %arg21[%c0_72, %c0_73] : memref<32x32xf32, #tpu.memory_space<vmem>>, vector<32x32xf32>
    tpu.vector_store %arg21[%c0_72, %c0_73], %184 {strides = array<i32>} : memref<32x32xf32, #tpu.memory_space<vmem>>, vector<32x32xf32>,
    %c1_i32 = arith.constant 1 : i32
    %186 = arith.cmpi eq, %arg1, %c1_i32 : i32
    %187 = arith.extui %186 : i1 to i32
    %c0_i32_74 = arith.constant 0 : i32
    %188 = arith.cmpi ne, %187, %c0_i32_74 : i32
    scf.if %188 {
      %189 = vector.shape_cast %184 : vector<32x32xf32> to vector<2x16x32xf32>
      %190 = vector.extract_strided_slice %189 {offsets = [0, 15, 0], sizes = [2, 1, 32], strides = [1, 1, 1]} : vector<2x16x32xf32> to vector<2x1x32xf32>
      %191 = vector.shape_cast %190 : vector<2x1x32xf32> to vector<2x32xf32>
      %192 = arith.truncf %191 : vector<2x32xf32> to vector<2x32xbf16>
      %c0_75 = arith.constant 0 : index
      %c0_76 = arith.constant 0 : index
      %193 = vector.load %arg18[%c0_75, %c0_76] : memref<32x4xf32, #tpu.memory_space<vmem>>, vector<32x4xf32>
      %194 = arith.truncf %193 : vector<32x4xf32> to vector<32x4xbf16>
      %cst_77 = arith.constant dense<0.000000e+00> : vector<2x4xf32>
      %195 = tpu.matmul %192, %194, %cst_77 {dimension_numbers = #tpu.dot_dimension_numbers<[1], [0], [0], [1], [0, 0, 1, 1], [], []>} : vector<2x32xbf16>, vector<32x4xbf16>, vector<2x4xf32> -> vector<2x4xf32>
      %c0_78 = arith.constant 0 : index
      %c0_79 = arith.constant 0 : index
      %196 = vector.load %arg19[%c0_78, %c0_79] : memref<1x4xf32, #tpu.memory_space<vmem>>, vector<1x4xf32>
      %197 = vector.broadcast %196 : vector<1x4xf32> to vector<2x4xf32>
      %198 = arith.addf %195, %197 : vector<2x4xf32>
      %c0_80 = arith.constant 0 : index
      %c0_81 = arith.constant 0 : index
      %199 = vector.load %arg20[%c0_80, %c0_81] : memref<2x4xf32, #tpu.memory_space<vmem>>, vector<2x4xf32>
      tpu.vector_store %arg20[%c0_80, %c0_81], %198 {strides = array<i32>} : memref<2x4xf32, #tpu.memory_space<vmem>>, vector<2x4xf32>,
    } else {
    }
    return
  }
  func.func @transform_0(%arg0: i32, %arg1: i32) -> (i32, i32, i32) {
    %c0_i32 = arith.constant 0 : i32
    %c0_i32_0 = arith.constant 0 : i32
    %c0_i32_1 = arith.constant 0 : i32
    return %arg0, %c0_i32, %c0_i32_0 : i32, i32, i32
  }
  func.func @transform_1(%arg0: i32, %arg1: i32) -> (i32, i32) {
    %c0_i32 = arith.constant 0 : i32
    %c0_i32_0 = arith.constant 0 : i32
    %c0_i32_1 = arith.constant 0 : i32
    return %c0_i32, %c0_i32_0 : i32, i32
  }
  func.func @transform_2(%arg0: i32, %arg1: i32) -> (i32, i32) {
    %c0_i32 = arith.constant 0 : i32
    %c0_i32_0 = arith.constant 0 : i32
    %c0_i32_1 = arith.constant 0 : i32
    return %c0_i32, %c0_i32_0 : i32, i32
  }
  func.func @transform_3(%arg0: i32, %arg1: i32) -> (i32, i32) {
    %c0_i32 = arith.constant 0 : i32
    %c0_i32_0 = arith.constant 0 : i32
    %c0_i32_1 = arith.constant 0 : i32
    return %c0_i32, %c0_i32_0 : i32, i32
  }
  func.func @transform_4(%arg0: i32, %arg1: i32) -> (i32, i32, i32) {
    %c0_i32 = arith.constant 0 : i32
    %c0_i32_0 = arith.constant 0 : i32
    %c0_i32_1 = arith.constant 0 : i32
    return %arg1, %c0_i32, %c0_i32_0 : i32, i32, i32
  }
  func.func @transform_5(%arg0: i32, %arg1: i32) -> (i32, i32, i32) {
    %c0_i32 = arith.constant 0 : i32
    %c0_i32_0 = arith.constant 0 : i32
    %c0_i32_1 = arith.constant 0 : i32
    return %arg1, %c0_i32, %c0_i32_0 : i32, i32, i32
  }
  func.func @transform_6(%arg0: i32, %arg1: i32) -> (i32, i32, i32) {
    %c0_i32 = arith.constant 0 : i32
    %c0_i32_0 = arith.constant 0 : i32
    %c0_i32_1 = arith.constant 0 : i32
    return %arg1, %c0_i32, %c0_i32_0 : i32, i32, i32
  }
  func.func @transform_7(%arg0: i32, %arg1: i32) -> (i32, i32, i32) {
    %c0_i32 = arith.constant 0 : i32
    %c0_i32_0 = arith.constant 0 : i32
    %c0_i32_1 = arith.constant 0 : i32
    return %arg1, %c0_i32, %c0_i32_0 : i32, i32, i32
  }
  func.func @transform_8(%arg0: i32, %arg1: i32) -> (i32, i32, i32) {
    %c0_i32 = arith.constant 0 : i32
    %c0_i32_0 = arith.constant 0 : i32
    %c0_i32_1 = arith.constant 0 : i32
    return %arg1, %c0_i32, %c0_i32_0 : i32, i32, i32
  }
  func.func @transform_9(%arg0: i32, %arg1: i32) -> (i32, i32, i32) {
    %c0_i32 = arith.constant 0 : i32
    %c0_i32_0 = arith.constant 0 : i32
    %c0_i32_1 = arith.constant 0 : i32
    return %arg1, %c0_i32, %c0_i32_0 : i32, i32, i32
  }
  func.func @transform_10(%arg0: i32, %arg1: i32) -> (i32, i32, i32) {
    %c0_i32 = arith.constant 0 : i32
    %c0_i32_0 = arith.constant 0 : i32
    %c0_i32_1 = arith.constant 0 : i32
    return %arg1, %c0_i32, %c0_i32_0 : i32, i32, i32
  }
  func.func @transform_11(%arg0: i32, %arg1: i32) -> (i32, i32, i32) {
    %c0_i32 = arith.constant 0 : i32
    %c0_i32_0 = arith.constant 0 : i32
    %c0_i32_1 = arith.constant 0 : i32
    return %arg1, %c0_i32, %c0_i32_0 : i32, i32, i32
  }
  func.func @transform_12(%arg0: i32, %arg1: i32) -> (i32, i32, i32) {
    %c0_i32 = arith.constant 0 : i32
    %c0_i32_0 = arith.constant 0 : i32
    %c0_i32_1 = arith.constant 0 : i32
    return %arg1, %c0_i32, %c0_i32_0 : i32, i32, i32
  }
  func.func @transform_13(%arg0: i32, %arg1: i32) -> (i32, i32, i32) {
    %c0_i32 = arith.constant 0 : i32
    %c0_i32_0 = arith.constant 0 : i32
    %c0_i32_1 = arith.constant 0 : i32
    return %arg1, %c0_i32, %c0_i32_0 : i32, i32, i32
  }
  func.func @transform_14(%arg0: i32, %arg1: i32) -> (i32, i32, i32) {
    %c0_i32 = arith.constant 0 : i32
    %c0_i32_0 = arith.constant 0 : i32
    %c0_i32_1 = arith.constant 0 : i32
    return %arg1, %c0_i32, %c0_i32_0 : i32, i32, i32
  }
  func.func @transform_15(%arg0: i32, %arg1: i32) -> (i32, i32, i32) {
    %c0_i32 = arith.constant 0 : i32
    %c0_i32_0 = arith.constant 0 : i32
    %c0_i32_1 = arith.constant 0 : i32
    return %arg1, %c0_i32, %c0_i32_0 : i32, i32, i32
  }
  func.func @transform_16(%arg0: i32, %arg1: i32) -> (i32, i32) {
    %c0_i32 = arith.constant 0 : i32
    %c0_i32_0 = arith.constant 0 : i32
    %c0_i32_1 = arith.constant 0 : i32
    return %c0_i32, %c0_i32_0 : i32, i32
  }
  func.func @transform_17(%arg0: i32, %arg1: i32) -> (i32, i32) {
    %c0_i32 = arith.constant 0 : i32
    %c0_i32_0 = arith.constant 0 : i32
    %c0_i32_1 = arith.constant 0 : i32
    return %c0_i32, %c0_i32_0 : i32, i32
  }
  func.func @transform_18(%arg0: i32, %arg1: i32) -> (i32, i32) {
    %c0_i32 = arith.constant 0 : i32
    %c0_i32_0 = arith.constant 0 : i32
    return %arg0, %c0_i32 : i32, i32
  }
}

</mosaic_0001>

<bundles_post_ra>
// kernel: transformer_main_forward.1
= control target key start
LH: loop header
LB: loop body
LE: loop exit
PB: predicated region body
PF: predicated region fallthrough
CT: control target
= control target key end

     0   :  { %s4809_s0 = inlined_call_operand.vmem [shape: f32[2,16,8], index: 0, kind: input, shape index: {}]   ;;  %s4810_s1 = inlined_call_operand.hbm [shape: f32[8,32], index: 1, kind: input, shape index: {}]   ;;  %s4811_s2 = inlined_call_operand.hbm [shape: f32[1,32], index: 2, kind: input, shape index: {}]   ;;  %s4812_s3 = inlined_call_operand.hbm [shape: f32[16,32], index: 3, kind: input, shape index: {}]   ;;  %s4813_s4 = inlined_call_operand.hbm [shape: bf16[2,32,96], index: 4, kind: input, shape index: {}]   ;;  %s4814_s5 = inlined_call_operand.hbm [shape: f32[2,1,96], index: 5, kind: input, shape index: {}]   ;;  %s4815_s6 = inlined_call_operand.hbm [shape: bf16[2,32,32], index: 6, kind: input, shape index: {}]   ;;  %s4816_s7 = inlined_call_operand.hbm [shape: f32[2,1,32], index: 7, kind: input, shape index: {}]   ;;  %s4817_s8 = inlined_call_operand.hbm [shape: f32[2,1,32], index: 8, kind: input, shape index: {}]   ;;  %s4818_s9 = inlined_call_operand.hbm [shape: f32[2,1,32], index: 9, kind: input, shape index: {}]   ;;  %s4819_s10 = inlined_call_operand.hbm [shape: bf16[2,32,64], index: 10, kind: input, shape index: {}]   ;;  %s4820_s11 = inlined_call_operand.hbm [shape: f32[2,1,64], index: 11, kind: input, shape index: {}]   ;;  %s4821_s12 = inlined_call_operand.vmem [shape: bf16[2,64,32], index: 12, kind: input, shape index: {}]   ;;  %s4822_s13 = inlined_call_operand.hbm [shape: f32[2,1,32], index: 13, kind: input, shape index: {}]   ;;  %s4823_s14 = inlined_call_operand.vmem [shape: f32[2,1,32], index: 14, kind: input, shape index: {}]   ;;  %s4824_s15 = inlined_call_operand.vmem [shape: f32[2,1,32], index: 15, kind: input, shape index: {}]   ;;  %s4825_s16 = inlined_call_operand.hbm [shape: f32[32,4], index: 16, kind: input, shape index: {}]   ;;  %s4826_s17 = inlined_call_operand.vmem [shape: f32[1,4], index: 17, kind: input, shape index: {}]   ;;  %s4827_s18 = inlined_call_operand.hbm [shape: f32[2,4], index: 18, kind: output, shape index: {}]  }
   0x1   :  { %4852 = sst [smem:[#allocation43_spill]] %s4809_s0 }
   0x2   :  { %4853 = sst [smem:[#allocation44_spill]] %s4810_s1 }
   0x3   :  { %4854 = sst [smem:[#allocation45_spill]] %s4811_s2 }
   0x4   :  { %4855 = sst [smem:[#allocation46_spill]] %s4813_s4 }
   0x5   :  { %4856 = sst [smem:[#allocation47_spill]] %s4820_s11 }
   0x6   :  { %4857 = sst [smem:[#allocation48_spill]] %s4821_s12 }
   0x7   :  { %4858 = sst [smem:[#allocation49_spill]] %s4822_s13 }
   0x8   :  { %4859 = sst [smem:[#allocation50_spill]] %s4823_s14 }
   0x9   :  { %4860 = sst [smem:[#allocation51_spill]] %s4824_s15 }
   0xa   :  { %4861 = sst [smem:[#allocation52_spill]] %s4825_s16 }
   0xb   :  { %4862 = sst [smem:[#allocation53_spill]] %s4826_s17 }
   0xc   :  { %4863 = sst [smem:[#allocation54_spill]] %s4827_s18 }
   0xd   :  { %23 = vsyncpa [#allocation4], 0 }
   0xe   :  { %24 = vsyncpa [#allocation7], 0 }
   0xf   :  { %25 = vsyncpa [#allocation10], 0 }
  0x10   :  { %27 = vsyncpa [#allocation10 + $0x1], 0 }
  0x11   :  { %28 = vsyncpa [#allocation13], 0 }
  0x12   :  { %30 = vsyncpa [#allocation13 + $0x1], 0 }
  0x13   :  { %31 = vsyncpa [#allocation16], 0 }
  0x14   :  { %33 = vsyncpa [#allocation16 + $0x1], 0 }
  0x15   :  { %34 = vsyncpa [#allocation19], 0 }
  0x16   :  { %36 = vsyncpa [#allocation19 + $0x1], 0 }
  0x17   :  { %37 = vsyncpa [#allocation22], 0 }
  0x18   :  { %39 = vsyncpa [#allocation22 + $0x1], 0 }
  0x19   :  { %40 = vsyncpa [#allocation5], 0  ;;  %s4194_s27 = smov 0   ;;  %s4196_s28 = smov 0  }
  0x1a   :  { %s4198_s29 = smov 0   ;;  %s4200_s30 = smov 0  }
  0x1b   :  { %s4202_s0 = smov 0   ;;  %s4204_s19 = smov 0  }
  0x1c LB: > { %4864 = sst [smem:[#allocation34_spill]] %s4045_s28  ;;  %s4223_s1 = sadd.s32 4294967295, %s4061_s19   ;;  %s4061_s19 = sphi %s4204_s19, %s46_s19   ;;  %s4057_s0 = sphi %s4202_s0, %s4930_s0   ;;  %s4053_s30 = sphi %s4200_s30, %s4929_s30   ;;  %s4049_s29 = sphi %s4198_s29, %s4927_s29   ;;  %s4045_s28 = sphi %s4196_s28, %s4926_s28   ;;  %s4041_s27 = sphi %s4194_s27, %s4925_s27  }
  0x1d   : > { %4865 = sst [smem:[#allocation35_spill]] %s4049_s29  ;;  %p161_p0 = scmp.ne.s32.totalorder %s4049_s29, %s4045_s28 }
  0x1e   : > { %4866 = sst [smem:[#allocation36_spill]] %s4053_s30  ;;  %p162_p1 = scmp.eq.s32.totalorder %s4061_s19, 0 }
  0x1f   : > { %4867 = sst [smem:[#allocation37_spill]] %s4061_s19  ;;  %p167_p2 = scmp.ne.s32.totalorder %s4045_s28, %s4041_s27 }
  0x20   : > { %4868 = sst [smem:[#allocation38_spill]] %s4223_s1  ;;  %p4829_p3 = scmp.eq.s32.totalorder %s4223_s1, 0 }
  0x21   : > { %p3018_p4 = scmp.ge.s32.totalorder %s4061_s19, 1  ;;  %p163_p5 = por %p162_p1, %p161_p0 }
  0x22   : > { %p532_p6 = scmp.lt.s32.totalorder %s4061_s19, 3  ;;  %p4234_p7 = por %p4829_p3, %p167_p2 }
  0x23   : > { %s4063_s22 = smov [#allocation6]   ;;  %p3393_p10 = scmp.lt.s32.totalorder %s4061_s19, 2 }
  0x24   : > { %s4869_s20 = scalar_select %p4234_p7, 1, 0 }
  0x25   : > { %p4238_p8 = pnand %p3018_p4, %p532_p6  ;;  %s566_s2 = sshll.u32 %s4063_s22, 4  ;;  %s567_s2 = int_to_ptr.vmem [resolvable:$true] %s566_s2 }
  0x26   : > { %4870 = sst [smem:[#allocation39_spill]] %s4869_s20  ;;  %p4251_p12 = pnand %p3393_p10, %p163_p5 }
  0x27   : > { %s4871_s21 = scalar_select %p4238_p8, 1, 0 }
  0x28   : > { %p3348_p9 = pneg %p4238_p8  ;;  %s4064_s25 = smov [#allocation23]  }
  0x29   : > { %4872 = sst [smem:[#allocation40_spill]] %s4871_s21  ;;  %s589_s26 = sshll.u32 %s4064_s25, 4  ;;  %s590_s26 = int_to_ptr.vmem [resolvable:$true] %s589_s26 }
  0x2a   : > { %p4247_p11 = pnand %p3348_p9, %p4829_p3  ;;  %s3610_s27 = scalar_lea.vmem %s567_s2, 16 }
  0x2b   : > { %s4874_s24 = scalar_select %p4251_p12, 1, 0 }
  0x2c   : > { %p3601_p13 = pneg %p4247_p11  ;;  %p3611_p0 = scmp.ne.s32.totalorder %s567_s2, %s3610_s27 }
  0x2d   : > { %s3617_s22 = scalar_lea.vmem %s567_s2, 32  ;;  %p3618_p4 = scmp.lt.s32.totalorder %s567_s2, %s567_s2 }
  0x2e   : > { %p3613_p1 = pnand %p3611_p0, %p3601_p13  ;;  %p3619_p6 = scmp.lt.s32.totalorder %s3617_s22, %s3610_s27 }
  0x30   : > { %p3614_p2 = pneg %p3613_p1  ;;  %p3620_p9 = por %p3619_p6, %p3618_p4 }
  0x32   : > { %p3621_p3 = pnand %p3620_p9, %p3614_p2 }
  0x34   : > { %3624 = shalt.err (!%p3621_p3)
}
  0x35   : > { %s4875_s15 = sld [smem:[#allocation45_spill]]  ;;  %s3636_s25 = scalar_lea.vmem %s590_s26, 512 }
  0x36   : > { %p3637_p5 = scmp.ne.s32.totalorder %s590_s26, %s3636_s25  ;;  %p3644_p1 = scmp.lt.s32.totalorder %s590_s26, %s590_s26 }
  0x37   : > { %p3645_p7 = scmp.lt.s32.totalorder %s3636_s25, %s3636_s25 }
  0x38   : > { %p3639_p10 = pnand %p3637_p5, %p3601_p13 }
  0x39   : > { %p3646_p8 = por %p3645_p7, %p3644_p1 }
  0x3a   : > { %p3640_p0 = pneg %p3639_p10 }
  0x3b   : > { %3354 = dma.hbm_to_vmem [thread:$0]  (!%p4247_p11), %s4875_s15, 16, %s567_s2, [#allocation7]  }
  0x3c   : > { %p3647_p4 = pnand %p3646_p8, %p3640_p0 }
  0x3e   : > { %3650 = shalt.err (!%p3647_p4)
}
  0x3f   : > { %s4833_s27 = smov 128   ;;  %s4834_s15 = smov 8  }
  0x40   : > { %s4876_s16 = sld [smem:[#allocation52_spill]]  ;;  %s154_s2 = sadd.s32 1, %s4049_s29 }
  0x41   : > { %s4278_s22 = sand.u32 1, %s4061_s19   ;;  %s55_s25 = sadd.s32 1, %s4057_s0 }
  0x42   : > { %p56_p3 = scmp.ge.s32.totalorder %s55_s25, 2  ;;  %s4282_s12 = sand.u32 1, %s4049_s29  }
  0x43   : > { %s4285_s14 = sshll.u32 %s4282_s12, 4  ;;  %s4288_s30 = sshll.u32 %s4057_s0, 8 }
  0x44   : > { %s4932_s25 = smov (%p56_p3, %s55_s25), 0  ;;  %s4878_s4 = sld [smem:[#allocation46_spill]] }
  0x45   : > { %4877 = sst [smem:[#allocation41_spill]] %s4932_s25  ;;  %s4846_s20 = scalar_lea.sflag [#allocation10], %s4278_s22 }
  0x46   : > { %3360 = dma.hbm_to_vmem [thread:$0]  (!%p4247_p11), %s4876_s16, 512, %s590_s26, [#allocation22], %s4833_s27, %s4833_s27, %s4834_s15  }
  0x47   : > { %s151_s27 = ssub.s32 %s4057_s0, %s4932_s25  ;;  %s610_s15 = scalar_lea.vmem [#allocation9], %s4285_s14 }
  0x48   : > { %s617_s16 = sshll.u32 %s610_s15, 4  ;;  %p152_p7 = scmp.eq.s32.totalorder %s151_s27, 0  ;;  %s618_s16 = int_to_ptr.vmem [resolvable:$true] %s617_s16 }
  0x49   : > { %p4305_p8 = pneg %p4251_p12  ;;  %s3664_s1 = scalar_lea.vmem %s618_s16, 256 }
  0x4a   : > { %s616_s18 = scalar_lea.hbm %s4878_s4, %s4288_s30  ;;  %p3665_p2 = scmp.ne.s32.totalorder %s618_s16, %s3664_s1 }
  0x4b   : > { %s4300_s19 = scalar_select %p152_p7, %s4049_s29, %s154_s2  }
  0x4c   : > { %s4880_s28 = scalar_select %p4305_p8, 1, 0 }
  0x4d   : > { %4879 = sst [smem:[#allocation42_spill]] %s4300_s19  ;;  %p3667_p6 = pnand %p3665_p2, %p4305_p8 }
  0x4e   : > { %s4067_s17 = smov [#allocation9]  }
  0x4f   : > { %p3668_p9 = pneg %p3667_p6  ;;  %s3669_s26 = sshll.u32 %s4067_s17, 4  ;;  %s3670_s26 = int_to_ptr.vmem [resolvable:$false] %s3669_s26 }
  0x50   : > { %s3671_s15 = scalar_lea.vmem %s3670_s26, 512  ;;  %p3672_p5 = scmp.lt.s32.totalorder %s618_s16, %s3670_s26 }
  0x51   : > { %p3673_p10 = scmp.lt.s32.totalorder %s3671_s15, %s3664_s1 }
  0x53   : > { %p3674_p0 = por %p3673_p10, %p3672_p5 }
  0x55   : > { %p3675_p1 = pnand %p3674_p0, %p3668_p9 }
  0x57   : > { %3678 = shalt.err (!%p3675_p1)
}
  0x58   : > { %s4068_s27 = smov 64   ;;  %s4069_s2 = smov 4  }
  0x59   : > { %3364 = dma.hbm_to_vmem [thread:$0]  (!%p4251_p12), %s616_s18, 256, %s618_s16, %s4846_s20, %s4068_s27, %s4068_s27, %s4069_s2  }
  0x5a   : > { %s654_s26 = scalar_lea.hbm %s4815_s6, %s4288_s30  ;;  %s648_s15 = scalar_lea.vmem [#allocation12], %s4285_s14 }
  0x5b   : > { %s655_s4 = sshll.u32 %s648_s15, 4  ;;  %s4324_s25 = sshll.u32 %s4057_s0, 4  ;;  %s656_s4 = int_to_ptr.vmem [resolvable:$true] %s655_s4 }
  0x5c   : > { %s4847_s19 = scalar_lea.sflag [#allocation13], %s4278_s22  ;;  %s3692_s29 = scalar_lea.vmem %s656_s4, 256 }
  0x5d   : > { %p3693_p4 = scmp.ne.s32.totalorder %s656_s4, %s3692_s29  ;;  %s4070_s21 = smov [#allocation12]  }
  0x5e   : > { %s3697_s13 = sshll.u32 %s4070_s21, 4  ;;  %s3698_s13 = int_to_ptr.vmem [resolvable:$false] %s3697_s13 }
  0x5f   : > { %p3695_p3 = pnand %p3693_p4, %p4305_p8  ;;  %s3699_s11 = scalar_lea.vmem %s3698_s13, 512 }
  0x60   : > { %p3700_p2 = scmp.lt.s32.totalorder %s656_s4, %s3698_s13  ;;  %p3701_p6 = scmp.lt.s32.totalorder %s3699_s11, %s3692_s29 }
  0x61   : > { %p3696_p7 = pneg %p3695_p3 }
  0x62   : > { %p3702_p9 = por %p3701_p6, %p3700_p2 }
  0x64   : > { %p3703_p5 = pnand %p3702_p9, %p3696_p7 }
  0x66   : > { %3706 = shalt.err (!%p3703_p5)
}
  0x67   : > { %3370 = dma.hbm_to_vmem [thread:$0]  (!%p4251_p12), %s654_s26, 256, %s656_s4, %s4847_s19, %s4068_s27, %s4068_s27, %s4069_s2  }
  0x68   : > { %s690_s13 = scalar_lea.hbm %s4817_s8, %s4324_s25  ;;  %s685_s11 = scalar_lea.vmem [#allocation15], %s4282_s12 }
  0x69   : > { %s692_s29 = sshll.u32 %s685_s11, 4  ;;  %s683_s18 = scalar_lea.sflag [#allocation16], %s4278_s22  ;;  %s693_s29 = int_to_ptr.vmem [resolvable:$true] %s692_s29 }
  0x6a   : > { %s3720_s17 = scalar_lea.vmem %s693_s29, 16  ;;  %s4071_s1 = smov [#allocation15]  }
  0x6b   : > { %p3721_p10 = scmp.ne.s32.totalorder %s693_s29, %s3720_s17  ;;  %s3725_s15 = sshll.u32 %s4071_s1, 4  ;;  %s3726_s15 = int_to_ptr.vmem [resolvable:$false] %s3725_s15 }
  0x6c   : > { %s3727_s20 = scalar_lea.vmem %s3726_s15, 32  ;;  %p3728_p4 = scmp.lt.s32.totalorder %s693_s29, %s3726_s15 }
  0x6d   : > { %p3723_p0 = pnand %p3721_p10, %p4305_p8  ;;  %p3729_p3 = scmp.lt.s32.totalorder %s3727_s20, %s3720_s17 }
  0x6f   : > { %p3724_p1 = pneg %p3723_p0  ;;  %p3730_p7 = por %p3729_p3, %p3728_p4 }
  0x71   : > { %p3731_p2 = pnand %p3730_p7, %p3724_p1 }
  0x73   : > { %3734 = shalt.err (!%p3731_p2)
}
  0x74   : > { %3376 = dma.hbm_to_vmem [thread:$0]  (!%p4251_p12), %s690_s13, 16, %s693_s29, %s683_s18  }
  0x75   : > { %s726_s16 = scalar_lea.hbm %s4819_s10, %s4288_s30  ;;  %s720_s21 = scalar_lea.vmem [#allocation18], %s4285_s14 }
  0x76   : > { %s727_s11 = sshll.u32 %s720_s21, 4  ;;  %s717_s20 = scalar_lea.sflag [#allocation19], %s4278_s22  ;;  %s728_s11 = int_to_ptr.vmem [resolvable:$true] %s727_s11 }
  0x77   : > { %s3748_s17 = scalar_lea.vmem %s728_s11, 256  ;;  %s4072_s1 = smov [#allocation18]  }
  0x78   : > { %p3749_p6 = scmp.ne.s32.totalorder %s728_s11, %s3748_s17  ;;  %s3753_s15 = sshll.u32 %s4072_s1, 4  ;;  %s3754_s15 = int_to_ptr.vmem [resolvable:$false] %s3753_s15 }
  0x79   : > { %s3755_s19 = scalar_lea.vmem %s3754_s15, 512  ;;  %p3756_p10 = scmp.lt.s32.totalorder %s728_s11, %s3754_s15 }
  0x7a   : > { %p3751_p9 = pnand %p3749_p6, %p4305_p8  ;;  %p3757_p0 = scmp.lt.s32.totalorder %s3755_s19, %s3748_s17 }
  0x7c   : > { %p3752_p5 = pneg %p3751_p9  ;;  %p3758_p1 = por %p3757_p0, %p3756_p10 }
  0x7e   : > { %p3759_p4 = pnand %p3758_p1, %p3752_p5 }
  0x80   : > { %3762 = shalt.err (!%p3759_p4)
}
  0x81   : > { %3382 = dma.hbm_to_vmem [thread:$0]  (!%p4251_p12), %s726_s16, 256, %s728_s11, %s717_s20, %s4068_s27, %s4068_s27, %s4069_s2  }
  0x82   : > { %s4073_s14 = smov [#allocation3]   ;;  %s4074_s13 = smov [#allocation8]  }
  0x83   : > { %s555_s30 = sshll.u32 %s4073_s14, 4  ;;  %s576_s29 = sshll.u32 %s4074_s13, 4  ;;  %s556_s30 = int_to_ptr.vmem [resolvable:$true] %s555_s30  ;;  %s577_s29 = int_to_ptr.vmem [resolvable:$true] %s576_s29 }
  0x84   : > { %s3774_s4 = scalar_lea.vmem %s556_s30, 128  ;;  %p3782_p6 = scmp.lt.s32.totalorder %s556_s30, %s556_s30 }
  0x85   : > { %p3775_p3 = scmp.ne.s32.totalorder %s556_s30, %s3774_s4  ;;  %p3783_p9 = scmp.lt.s32.totalorder %s3774_s4, %s3774_s4 }
  0x87   : > { %p3777_p7 = pnand %p3775_p3, %p3601_p13  ;;  %p3784_p5 = por %p3783_p9, %p3782_p6 }
  0x89   : > { %p3778_p2 = pneg %p3777_p7 }
  0x8b   : > { %p3785_p10 = pnand %p3784_p5, %p3778_p2 }
  0x8d   : > { %3788 = shalt.err (!%p3785_p10)
}
  0x8e   : > { %s4881_s2 = sld [smem:[#allocation44_spill]]  ;;  %s3800_s26 = scalar_lea.vmem %s577_s29, 256 }
  0x8f   : > { %p3801_p0 = scmp.ne.s32.totalorder %s577_s29, %s3800_s26  ;;  %p3808_p3 = scmp.lt.s32.totalorder %s577_s29, %s577_s29 }
  0x90   : > { %p3809_p7 = scmp.lt.s32.totalorder %s3800_s26, %s3800_s26 }
  0x91   : > { %p3803_p1 = pnand %p3801_p0, %p3601_p13 }
  0x92   : > { %p3810_p12 = por %p3809_p7, %p3808_p3 }
  0x93   : > { %p3804_p4 = pneg %p3803_p1 }
  0x94   : > { %3351 = dma.hbm_to_vmem [thread:$0]  (!%p4247_p11), %s4881_s2, 128, %s556_s30, [#allocation4]  }
  0x95   : > { %p3811_p8 = pnand %p3810_p12, %p3804_p4 }
  0x97   : > { %3814 = shalt.err (!%p3811_p8)
}
  0x98   : > { %s4882_s16 = smov 8   ;;  %s4883_s21 = smov 128  }
  0x99   : > { %3357 = dma.hbm_to_vmem [thread:$0]  (!%p4247_p11), %s4812_s3, 256, %s577_s29, [#allocation7], %s4883_s21, %s4883_s21, %s4882_s16  }
  0x9a   : > { %s635_s14 = scalar_lea.hbm %s4814_s5, %s4324_s25  ;;  %s630_s30 = scalar_lea.vmem [#allocation11], %s4282_s12 }
  0x9b   : > { %s637_s13 = sshll.u32 %s630_s30, 4  ;;  %s673_s19 = scalar_lea.hbm %s4816_s7, %s4324_s25  ;;  %s638_s13 = int_to_ptr.vmem [resolvable:$true] %s637_s13 }
  0x9c   : > { %s3828_s27 = scalar_lea.vmem %s638_s13, 16  ;;  %p4884_p13 = scmp.ne.s32.totalorder %s4880_s28, 0 }
  0x9d   : > { %p3829_p12 = scmp.ne.s32.totalorder %s638_s13, %s3828_s27  ;;  %s4075_s2 = smov [#allocation11]  }
  0x9e   : > { %s3833_s26 = sshll.u32 %s4075_s2, 4  ;;  %s3834_s26 = int_to_ptr.vmem [resolvable:$false] %s3833_s26 }
  0x9f   : > { %p3831_p8 = pnand %p3829_p12, %p4884_p13  ;;  %s3835_s29 = scalar_lea.vmem %s3834_s26, 32 }
  0xa0   : > { %p3836_p11 = scmp.lt.s32.totalorder %s638_s13, %s3834_s26  ;;  %p3837_p6 = scmp.lt.s32.totalorder %s3835_s29, %s3828_s27 }
  0xa1   : > { %p3832_p2 = pneg %p3831_p8 }
  0xa2   : > { %p3838_p9 = por %p3837_p6, %p3836_p11 }
  0xa4   : > { %p3839_p5 = pnand %p3838_p9, %p3832_p2 }
  0xa6   : > { %3842 = shalt.err (!%p3839_p5)
}
  0xa7   : > { %p4885_p10 = scmp.ne.s32.totalorder %s4874_s24, 0  ;;  %s4886_s16 = scalar_lea.sflag [#allocation10], %s4278_s22 }
  0xa8   : > { %s668_s21 = scalar_lea.vmem [#allocation14], %s4282_s12  ;;  %s707_s15 = scalar_lea.hbm %s4818_s9, %s4324_s25 }
  0xa9   : > { %3367 = dma.hbm_to_vmem [thread:$0]  (!%p4885_p10), %s635_s14, 16, %s638_s13, %s4886_s16  }
  0xaa   : > { %s675_s11 = sshll.u32 %s668_s21, 4  ;;  %s4076_s4 = smov [#allocation14]   ;;  %s676_s11 = int_to_ptr.vmem [resolvable:$true] %s675_s11 }
  0xab   : > { %s3856_s30 = scalar_lea.vmem %s676_s11, 16  ;;  %s3861_s23 = sshll.u32 %s4076_s4, 4  ;;  %s3862_s23 = int_to_ptr.vmem [resolvable:$false] %s3861_s23 }
  0xac   : > { %p3857_p0 = scmp.ne.s32.totalorder %s676_s11, %s3856_s30  ;;  %s3863_s27 = scalar_lea.vmem %s3862_s23, 32 }
  0xad   : > { %p3864_p3 = scmp.lt.s32.totalorder %s676_s11, %s3862_s23  ;;  %p3865_p7 = scmp.lt.s32.totalorder %s3863_s27, %s3856_s30 }
  0xae   : > { %p3859_p1 = pnand %p3857_p0, %p4884_p13 }
  0xaf   : > { %p3866_p12 = por %p3865_p7, %p3864_p3 }
  0xb0   : > { %p3860_p4 = pneg %p3859_p1 }
  0xb2   : > { %p3867_p8 = pnand %p3866_p12, %p3860_p4 }
  0xb4   : > { %3870 = shalt.err (!%p3867_p8)
}
  0xb5   : > { %s4887_s14 = scalar_lea.sflag [#allocation13], %s4278_s22  ;;  %s702_s26 = scalar_lea.vmem [#allocation17], %s4282_s12 }
  0xb6   : > { %3373 = dma.hbm_to_vmem [thread:$0]  (!%p4885_p10), %s673_s19, 16, %s676_s11, %s4887_s14  }
  0xb7   : > { %s709_s29 = sshll.u32 %s702_s26, 4  ;;  %s4888_s17 = sld [smem:[#allocation47_spill]]  ;;  %s710_s29 = int_to_ptr.vmem [resolvable:$true] %s709_s29 }
  0xb8   : > { %s3884_s30 = scalar_lea.vmem %s710_s29, 16  ;;  %s4077_s4 = smov [#allocation17]  }
  0xb9   : > { %p3885_p2 = scmp.ne.s32.totalorder %s710_s29, %s3884_s30  ;;  %s3889_s23 = sshll.u32 %s4077_s4, 4  ;;  %s3890_s23 = int_to_ptr.vmem [resolvable:$false] %s3889_s23 }
  0xba   : > { %s3891_s27 = scalar_lea.vmem %s3890_s23, 32  ;;  %p3892_p9 = scmp.lt.s32.totalorder %s710_s29, %s3890_s23 }
  0xbb   : > { %p3887_p11 = pnand %p3885_p2, %p4884_p13  ;;  %p3893_p5 = scmp.lt.s32.totalorder %s3891_s27, %s3884_s30 }
  0xbd   : > { %s745_s1 = scalar_lea.hbm %s4888_s17, %s4324_s25  ;;  %p3888_p6 = pneg %p3887_p11 }
  0xbe   : > { %p3894_p0 = por %p3893_p5, %p3892_p9 }
  0xc0   : > { %p3895_p1 = pnand %p3894_p0, %p3888_p6 }
  0xc2   : > { %3898 = shalt.err (!%p3895_p1)
}
  0xc3   : > { %3379 = dma.hbm_to_vmem [thread:$0]  (!%p4885_p10), %s707_s15, 16, %s710_s29, %s683_s18  }
  0xc4   : > { %s740_s14 = scalar_lea.vmem [#allocation20], %s4282_s12  ;;  %s4078_s26 = smov [#allocation20]  }
  0xc5   : > { %s747_s13 = sshll.u32 %s740_s14, 4  ;;  %s3917_s16 = sshll.u32 %s4078_s26, 4  ;;  %s748_s13 = int_to_ptr.vmem [resolvable:$true] %s747_s13  ;;  %s3918_s16 = int_to_ptr.vmem [resolvable:$false] %s3917_s16 }
  0xc6   : > { %s3912_s2 = scalar_lea.vmem %s748_s13, 16  ;;  %s3919_s21 = scalar_lea.vmem %s3918_s16, 32 }
  0xc7   : > { %p3913_p4 = scmp.ne.s32.totalorder %s748_s13, %s3912_s2  ;;  %p3920_p12 = scmp.lt.s32.totalorder %s748_s13, %s3918_s16 }
  0xc8   : > { %p3921_p8 = scmp.lt.s32.totalorder %s3919_s21, %s3912_s2 }
  0xc9   : > { %p3915_p3 = pnand %p3913_p4, %p4884_p13 }
  0xca   : > { %p3922_p2 = por %p3921_p8, %p3920_p12 }
  0xcb   : > { %p3916_p7 = pneg %p3915_p3 }
  0xcd   : > { %p3923_p11 = pnand %p3922_p2, %p3916_p7 }
  0xcf   : > { %3926 = shalt.err (!%p3923_p11)
}
  0xd0   : > { %3385 = dma.hbm_to_vmem [thread:$0]  (!%p4885_p10), %s745_s1, 16, %s748_s13, %s717_s20  }
  0xd1   : > { %s4889_s4 = sld [smem:[#allocation49_spill]]  ;;  %s765_s27 = scalar_lea.vmem [#allocation21], %s4282_s12 }
  0xd2   : > { %s772_s19 = sshll.u32 %s765_s27, 4  ;;  %s763_s11 = scalar_lea.sflag [#allocation22], %s4278_s22  ;;  %s773_s19 = int_to_ptr.vmem [resolvable:$true] %s772_s19 }
  0xd3   : > { %s3940_s14 = scalar_lea.vmem %s773_s19, 16  ;;  %s4079_s2 = smov [#allocation21]  }
  0xd4   : > { %p3941_p6 = scmp.ne.s32.totalorder %s773_s19, %s3940_s14  ;;  %s3945_s26 = sshll.u32 %s4079_s2, 4  ;;  %s3946_s26 = int_to_ptr.vmem [resolvable:$false] %s3945_s26 }
  0xd5   : > { %s3947_s16 = scalar_lea.vmem %s3946_s26, 32  ;;  %p3948_p0 = scmp.lt.s32.totalorder %s773_s19, %s3946_s26 }
  0xd6   : > { %p3943_p9 = pnand %p3941_p6, %p4884_p13  ;;  %p3949_p1 = scmp.lt.s32.totalorder %s3947_s16, %s3940_s14 }
  0xd7   : > { %s770_s23 = scalar_lea.hbm %s4889_s4, %s4324_s25 }
  0xd8   : > { %p3944_p5 = pneg %p3943_p9  ;;  %p3950_p4 = por %p3949_p1, %p3948_p0 }
  0xda   : > { %p3951_p3 = pnand %p3950_p4, %p3944_p5 }
  0xdc   : > { %3954 = shalt.err (!%p3951_p3)
}
  0xdd   : > { %3388 = dma.hbm_to_vmem [thread:$0]  (!%p4885_p10), %s770_s23, 16, %s773_s19, %s763_s11  }
  0xde   : > { %s4890_s12 = sld [smem:[#allocation40_spill]] }
  0xe4   : > { %p4891_p7 = scmp.ne.s32.totalorder %s4890_s12, 0 }
  0xe5   : > { %s4892_s22 = sld [smem:[#allocation38_spill]] (!%p4891_p7) }
  0xe6   : > { %793 = sbr.rel (%p4891_p7) target bundleno = 4719 (0x126f), region = 92 }
  0xeb   : > { %p4893_p12 = scmp.eq.s32.totalorder %s4892_s22, 0 }
  0xed   : > { %4004 = dma.done.wait (%p4893_p12), [#allocation4], 128   ;;  %p4894_p13 = pmov %p4893_p12 }
  0xee   : > { %p4895_p8 = pmov %p4893_p12 }
  0xef   : > { %4006 = vsyncadd (%p4894_p13), [#allocation4], 4294967168 }
  0xf0   : > { %4008 = dma.done.wait (%p4895_p8), [#allocation7], 272   ;;  %p4896_p2 = pmov %p4895_p8 }
  0xf1   : > { %s4897_s28 = sld [smem:[#allocation34_spill]]  ;;  %s807_s24 = sand.u32 1, %s4892_s22  }
  0xf2   : > { %4010 = vsyncadd (%p4896_p2), [#allocation7], 4294967024  ;;  %s4898_s25 = sld [smem:[#allocation39_spill]]  ;;  %s808_s13 = scalar_lea.sflag [#allocation10], %s807_s24 }
  0xf7   : > { %s4463_s20 = sand.u32 1, %s4897_s28  }
  0xf8   : > { %s4466_s1 = sshll.u32 %s4463_s20, 4  ;;  %p4899_p10 = scmp.ne.s32.totalorder %s4898_s25, 0 }
  0xf9   : > { %s811_s21 = scalar_lea.vmem [#allocation9], %s4466_s1 }
  0xfa   : > { %4012 = dma.done.wait (%p4899_p10), %s808_s13, 272  }
  0xfb   : > { %4014 = vsyncadd (%p4899_p10), %s808_s13, 4294967024  ;;  %s825_s15 = scalar_lea.sflag [#allocation13], %s807_s24 }
  0xfc   : > { %4016 = dma.done.wait (%p4899_p10), %s825_s15, 272  }
  0xfd   : > { %4018 = vsyncadd (%p4899_p10), %s825_s15, 4294967024  ;;  %s842_s4 = scalar_lea.sflag [#allocation16], %s807_s24 }
  0xfe   : > { %4020 = dma.done.wait (%p4899_p10), %s842_s4, 32  }
  0xff   : > { %4022 = vsyncadd (%p4899_p10), %s842_s4, 4294967264  ;;  %s858_s19 = scalar_lea.sflag [#allocation19], %s807_s24 }
 0x100   : > { %4024 = dma.done.wait (%p4899_p10), %s858_s19, 272  }
 0x101   : > { %4026 = vsyncadd (%p4899_p10), %s858_s19, 4294967024  ;;  %s875_s2 = scalar_lea.sflag [#allocation22], %s807_s24 }
 0x102   : > { %4028 = dma.done.wait (%p4899_p10), %s875_s2, 16  }
 0x103   : > { %4030 = vsyncadd (%p4899_p10), %s875_s2, 4294967280  ;;  %p4900_p11 = pmov %p4896_p2 }
 0x104   : > { %p4901_p6 = pmov %p4896_p2 }
 0x105   : > { %4032 = dma.done.wait (%p4900_p11), [#allocation22], 512  }
 0x106   : > { %4034 = vsyncadd (%p4901_p6), [#allocation22], 4294966784  ;;  %s4902_s16 = sld [smem:[#allocation36_spill]] }
 0x107   : > { %s4903_s15 = sld [smem:[#allocation50_spill]] }
 0x108   : > { %s4904_s2 = sld [smem:[#allocation48_spill]] }
 0x109   : > { %s4905_s27 = sld [smem:[#allocation51_spill]] }
 0x10c   : > { %p987_p9 = scmp.lt.s32.totalorder %s4902_s16, 1  ;;  %p3050_p5 = scmp.ne.s32.totalorder %s4902_s16, 0 }
 0x10d   : > { %s4906_s29 = sld [smem:[#allocation43_spill]] (!%p3050_p5) }
 0x10e   : > { %s4503_s12 = scalar_select %p987_p9, %s4902_s16, 1 }
 0x10f   : > { %1002 = sbr.rel (%p3050_p5) target bundleno = 487 (0x1e7), region = 148 }
 0x110   : > { %s3106_s28 = sshll.u32 %s4503_s12, 5  ;;  %s994_s25 = scalar_lea.vmem %s4903_s15, %s4503_s12 }
 0x111   : > { %s4513_s26 = scalar_lea.vmem %s4904_s2, %s3106_s28  ;;  %s997_s23 = scalar_lea.vmem %s4905_s27, %s4503_s12 }
 0x113   : > { %s4907_s18 = smov (!%p3050_p5), %s4906_s29 }
 0x114   : > { %v1009_v0 = vld [vmem:[#allocation3] sm:$0xff]  ;;  %vm1025_vm0 = vcmask 1043456   ;;  %v1004_v2 = vld [vmem:[%s4907_s18 + $0x8] sm:$0xff]  ;;  %vm1018_vm1 = vcmask 64512   ;;  %v1005_v5 = vld [vmem:[%s4907_s18 + $0x10] sm:$0xff]  ;;  %vm1084_vm2 = vcmask 261120  }
 0x115   : > { %v1003_v1 = vld [vmem:[%s4906_s29] sm:$0xff]  ;;  %v1010_v3 = vpack.c.bf16 %v1009_v0, %v1009_v0  ;;  %v1006_v6 = vld [vmem:[%s4907_s18 + $0x18] sm:$0xff]  ;;  %v3051_v9 = vld [vmem:[#allocation6] ss:$0 sm:$0xff] }
 0x116   : > { %v1007_v4 = vpack.c.bf16 %v1004_v2, %v1003_v1  ;;  %v1008_v8 = vpack.c.bf16 %v1006_v6, %v1005_v5  ;;  %v1078_v11 = vld [vmem:[#allocation8] sm:$0xff]  ;;  %v1079_v17 = vld [vmem:[#allocation8 + $0x8] sm:$0xff] }
 0x117   : > { %3309 = vmatprep.subr.msk.bf16.mxu0 %vm1025_vm0, %v1010_v3  ;;  %v1027_v7 = vsel %vm1025_vm0, %v1010_v3, 0 }
 0x118   : > { %3165 = vmatprep.mubr.msk.bf16.mxu0 %vm1018_vm1, %v1007_v4  ;;  %3164 = vmatpush3.bf16.msra.mxu0 %v1027_v7 }
 0x11b   : > { %3166 = vmatmul.mubr.msk.bf16.vlgmr.msra.gmra.mxu0 %vm1018_vm1, %v1008_v8 }
 0x1db   : > { %v3167_v10 = vpop.f32.mrf.mxu0 }
 0x1dc   : > { %v1072_v12 = vadd.f32 %v3167_v10, %v3051_v9 }
 0x1dd   : > { %v1063_v13 = vpop.f32.mrf.mxu0 }
 0x1de   : > { %v1082_v14 = vadd.f32 %v1078_v11, %v1072_v12  ;;  %v1064_v15 = vadd.f32 %v3051_v9, %v1063_v13 }
 0x1df   : > { %v3168_v16 = vpop.f32.mrf.mxu0 }
 0x1e0   : > { %1087 = vst.msk [vmem:[#allocation2 + $0x10] sm:$0xff] %vm1084_vm2, %v1082_v14  ;;  %v1080_v18 = vadd.f32 %v1078_v11, %v1064_v15  ;;  %v1075_v19 = vadd.f32 %v3168_v16, %v3051_v9 }
 0x1e1   : > { %v1066_v20 = vpop.f32.mrf.mxu0 }
 0x1e2   : > { %1085 = vst.msk [vmem:[#allocation2] sm:$0xff] %vm1084_vm2, %v1080_v18  ;;  %v1083_v21 = vadd.f32 %v1079_v17, %v1075_v19  ;;  %v1067_v22 = vadd.f32 %v3051_v9, %v1066_v20 }
 0x1e4   : > { %1088 = vst.msk [vmem:[#allocation2 + $0x18] sm:$0xff] %vm1084_vm2, %v1083_v21  ;;  %v1081_v23 = vadd.f32 %v1079_v17, %v1067_v22 }
 0x1e6   : > { %1086 = vst.msk [vmem:[#allocation2 + $0x8] sm:$0xff] %vm1084_vm2, %v1081_v23 }
 0x1e7 PF: > { %v3505_v24 = vld [vmem:[%s811_s21 + $0x8] sm:$0xff]   ;;  %v3506_v25 = vld [vmem:[%s811_s21] sm:$0xff]   ;;  %vm1118_vm3 = vcmask 261120   ;;  %v4080_v32 = vmov 0.0   ;;  %s4908_s21 = scalar_lea.vmem [#allocation11], %s4463_s20  ;;  %vm4081_vm4 = vmmov 0  }
 0x1e8   : > { %3169 = vmatprep.subr.bf16.mxu0 %v3505_v24  ;;  %v1091_v28 = vld [vmem:[#allocation2 + $0x10] sm:$0xff]  ;;  %3177 = vmatprep.subr.bf16.mxu1 %v4080_v32  ;;  %v3054_v34 = vld [vmem:[%s4908_s21] ss:$0 sm:$0xff]  ;;  %s4082_s29 = smov 96   ;;  %vm1185_vm5 = vcmask 64512   ;;  %vm1283_vm6 = vcmask 130048  }
 0x1e9   : > { %v1089_v26 = vld [vmem:[#allocation2] sm:$0xff]  ;;  %3170 = vmatpush3.bf16.msra.mxu0 %v3505_v24  ;;  %3179 = vmatprep.mubr.msk.bf16.mxu1 %vm4081_vm4, %v4080_v32  ;;  %s4083_s30 = smov 64   ;;  %s4084_s11 = smov 88   ;;  %vm2208_vm7 = vcmask 195584   ;;  %vm2497_vm8 = vcmask 523264  }
 0x1ea   : > { %3171 = vmatprep.subr.bf16.mxu0 %v3506_v25  ;;  %s4085_s16 = smov 120   ;;  %s4086_s4 = smov 56  }
 0x1eb   : > { %v1092_v30 = vld [vmem:[#allocation2 + $0x18] sm:$0xff]  ;;  %s4087_s19 = smov 80   ;;  %s4088_s2 = smov 112  }
 0x1ec   : > { %v1094_v31 = vpack.c.bf16 %v1092_v30, %v1091_v28  ;;  %s4089_s22 = smov 48   ;;  %s4090_s24 = smov 72  }
 0x1ed   : > { %v1090_v27 = vld [vmem:[#allocation2 + $0x8] sm:$0xff]  ;;  %3172 = vmatpush3.bf16.msra.mxu0 %v3506_v25  ;;  %s4091_s13 = smov 104   ;;  %s4092_s28 = smov 40  }
 0x1ee   : > { %v1093_v29 = vpack.c.bf16 %v1090_v27, %v1089_v26  ;;  %3183 = vmatprep.subr.bf16.mxu0 %v4080_v32  ;;  %s4093_s15 = smov 8   ;;  %s4094_s27 = smov 16  }
 0x1ef   : > { %s4909_s14 = scalar_lea.vmem [#allocation12], %s4466_s1 }
 0x1f0   : > { %3173 = vmatprep.mubr.msk.bf16.mxu0 %vm1118_vm3, %v1093_v29  ;;  %s4910_s21 = smov %s4909_s14 }
 0x1f1   : > { %3174 = vmatmul.mubr.msk.bf16.vlgmr.msra.gmra.mxu0 %vm1118_vm3, %v1094_v31 }
 0x1f2   : > { %3185 = vmatprep.mubr.msk.bf16.mxu0 %vm4081_vm4, %v4080_v32 }
 0x2b1   : > { %v3175_v33 = vpop.f32.mrf.mxu0 }
 0x2b2   : > { %v1168_v36 = vadd.f32 %v3175_v33, %v3054_v34 }
 0x2b3   : > { %v1159_v35 = vpop.f32.mrf.mxu0 }
 0x2b4   : > { %v1160_v38 = vadd.f32 %v3054_v34, %v1159_v35  ;;  %v1176_v41 = vmul.f32 0.35355338, %v1168_v36 }
 0x2b5   : > { %v3176_v37 = vpop.f32.mrf.mxu0 }
 0x2b6   : > { %v1171_v39 = vadd.f32 %v3176_v37, %v3054_v34  ;;  %v1174_v44 = vmul.f32 0.35355338, %v1160_v38 }
 0x2b7   : > { %v1162_v40 = vpop.f32.mrf.mxu0 }
 0x2b8   : > { %v1177_v42 = vmul.f32 0.35355338, %v1171_v39  ;;  %v1163_v43 = vadd.f32 %v3054_v34, %v1162_v40  ;;  %v4553_v49 = vpack.c.bf16 %v1171_v39, %v1168_v36 }
 0x2ba   : > { %v4546_v45 = vpack.c.bf16 %v1177_v42, %v1176_v41  ;;  %v1175_v46 = vmul.f32 0.35355338, %v1163_v43  ;;  %v4548_v47 = vpack.c.bf16 %v1163_v43, %v1160_v38 }
 0x2bc   : > { %v4550_v48 = vpack.c.bf16 %v1175_v46, %v1174_v44  ;;  %1183 = vrot.lane.b32.xlu0 %v4548_v47, %s4082_s29 }
 0x2c0   : > { %1234 = vrot.lane.b32.xlu0 %v4553_v49, %s4082_s29  ;;  %s4095_s29 = smov 24  }
 0x32e   : > { %v1184_v50 = vpop.permute.xlu0 %1183 }
 0x32f   : > { %v1190_v51 = vsel %vm1185_vm5, %v1184_v50, 0 }
 0x330   : > { %3178 = vmatpush3.bf16.xpose.msra.mxu1 %v1190_v51 }
 0x331   : > { %3189 = vmatprep.subr.bf16.mxu1 %v4080_v32 }
 0x332   : > { %v1235_v52 = vpop.permute.xlu0 %1234 }
 0x333   : > { %v1240_v53 = vsel %vm1185_vm5, %v1235_v52, 0 }
 0x334   : > { %3184 = vmatpush3.bf16.xpose.msra.mxu0 %v1240_v53 }
 0x335   : > { %3195 = vmatprep.subr.bf16.mxu0 %v4080_v32 }
 0x337   : > { %3180 = vmatmul.mubr.msk.bf16.vlgmr.msra.gmra.mxu1 %vm1185_vm5, %v4550_v48 }
 0x338   : > { %3191 = vmatprep.mubr.msk.bf16.mxu1 %vm4081_vm4, %v4080_v32 }
 0x33b   : > { %3186 = vmatmul.mubr.msk.bf16.vlgmr.msra.gmra.mxu0 %vm1185_vm5, %v4546_v45 }
 0x33c   : > { %3197 = vmatprep.mubr.msk.bf16.mxu0 %vm4081_vm4, %v4080_v32 }
 0x3f7   : > { %v1226_v54 = vpop.f32.mrf.mxu1 }
 0x3f8   : > { %v1284_v55 = vsel %vm1283_vm6, %v1226_v54, -inf }
 0x3f9   : > { %1285 = vmax.xlane.f32.xlu1 %v1284_v55  ;;  %v3181_v56 = vpop.f32.mrf.mxu1 }
 0x3fb   : > { %v1229_v57 = vpop.f32.mrf.mxu1  ;;  %v1276_v58 = vpop.f32.mrf.mxu0 }
 0x3fc   : > { %v1290_v59 = vsel %vm1283_vm6, %v1276_v58, -inf  ;;  %v1287_v60 = vsel %vm1283_vm6, %v1229_v57, -inf }
 0x3fd   : > { %1291 = vmax.xlane.f32.xlu0 %v1290_v59  ;;  %v3187_v61 = vpop.f32.mrf.mxu0  ;;  %1288 = vmax.xlane.f32.xlu1 %v1287_v60  ;;  %v3182_v62 = vpop.f32.mrf.mxu1 }
 0x3ff   : > { %v1279_v63 = vpop.f32.mrf.mxu0 }
 0x400   : > { %v1293_v0 = vsel %vm1283_vm6, %v1279_v63, -inf }
 0x401   : > { %v3188_v1 = vpop.f32.mrf.mxu0  ;;  %1294 = vmax.xlane.f32.xlu1 %v1293_v0 }
 0x412   : > { %1330 = vrot.lane.b32.xlu1 %v4548_v47, %s4083_s30 }
 0x413   : > { %1377 = vrot.lane.b32.xlu0 %v4553_v49, %s4083_s30  ;;  %s4911_s30 = scalar_lea.vmem [#allocation14], %s4463_s20 }
 0x416   : > { %1427 = vrot.lane.b32.xlu1 %v4548_v47, %s4084_s11 }
 0x41a   : > { %1479 = vrot.lane.b32.xlu1 %v4553_v49, %s4084_s11  ;;  %s4912_s11 = scalar_lea.vmem [#allocation18], %s4466_s1  ;;  %s4914_s1 = scalar_lea.vmem [#allocation15], %s4463_s20 }
 0x482   : > { %v1286_v2 = vpop.xlane.xlu1 %1285 }
 0x483   : > { %v1296_v3 = vsub.f32 %v1226_v54, %v1286_v2 }
 0x485   : > { %v1300_v7 = vmul.f32 1.442695, %v1296_v3 }
 0x486   : > { %v1292_v4 = vpop.xlane.xlu0 %1291  ;;  %v1289_v5 = vpop.xlane.xlu1 %1288 }
 0x487   : > { %v1298_v6 = vsub.f32 %v1276_v58, %v1292_v4  ;;  %v1297_v12 = vsub.f32 %v1229_v57, %v1289_v5 }
 0x489   : > { %v1304_v8 = vmul.f32 1.442695, %v1298_v6  ;;  %v1302_v15 = vmul.f32 1.442695, %v1297_v12 }
 0x48a   : > { %v1378_v9 = vpop.permute.xlu0 %1377  ;;  %v1295_v10 = vpop.xlane.xlu1 %1294 }
 0x48b   : > { %3515 = vpow2.f32 %v1304_v8  ;;  %v1299_v11 = vsub.f32 %v1279_v63, %v1295_v10  ;;  %3196 = vmatpush3.bf16.msra.mxu0 %v1378_v9 }
 0x48c   : > { %3207 = vmatprep.subr.bf16.mxu0 %v4080_v32  ;;  %3517 = vpow2.f32 %v1300_v7 }
 0x48d   : > { %v1306_v13 = vmul.f32 1.442695, %v1299_v11 }
 0x48e   : > { %v1331_v14 = vpop.permute.xlu1 %1330 }
 0x48f   : > { %3190 = vmatpush3.bf16.msra.mxu1 %v1331_v14  ;;  %3519 = vpow2.f32 %v1306_v13 }
 0x490   : > { %3201 = vmatprep.subr.bf16.mxu1 %v4080_v32  ;;  %3521 = vpow2.f32 %v1302_v15 }
 0x492   : > { %v1428_v24 = vpop.permute.xlu1 %1427 }
 0x493   : > { %v1433_v43 = vsel %vm1185_vm5, %v1428_v24, 0 }
 0x496   : > { %v1480_v25 = vpop.permute.xlu1 %1479 }
 0x497   : > { %v1485_v38 = vsel %vm1185_vm5, %v1480_v25, 0 }
 0x498   : > { %v3516_v16 = vpop.eup %3515 }
 0x499   : > { %v1314_v17 = vsel %vm1283_vm6, %v3516_v16, 0.0  ;;  %v3518_v18 = vpop.eup %3517 }
 0x49a   : > { %1315 = vadd.xlane.f32.xlu1 %v1314_v17  ;;  %v1308_v19 = vsel %vm1283_vm6, %v3518_v18, 0.0 }
 0x49c   : > { %v3520_v20 = vpop.eup %3519 }
 0x49d   : > { %v1317_v21 = vsel %vm1283_vm6, %v3520_v20, 0.0  ;;  %v3522_v22 = vpop.eup %3521 }
 0x49e   : > { %1309 = vadd.xlane.f32.xlu1 %v1308_v19  ;;  %v1311_v23 = vsel %vm1283_vm6, %v3522_v22, 0.0 }
 0x4a2   : > { %1318 = vadd.xlane.f32.xlu1 %v1317_v21 }
 0x4a6   : > { %1312 = vadd.xlane.f32.xlu1 %v1311_v23 }
 0x4b7   : > { %1425 = vrot.lane.b32.xlu1 %v4550_v48, %s4085_s16 }
 0x4bb   : > { %1477 = vrot.lane.b32.xlu1 %v4546_v45, %s4085_s16  ;;  %s4913_s16 = smov %s4912_s11 }
 0x523   : > { %v1316_v26 = vpop.xlane.xlu1 %1315 }
 0x524   : > { %3523 = vrcp.f32 %v1316_v26 }
 0x527   : > { %v1310_v27 = vpop.xlane.xlu1 %1309 }
 0x52b   : > { %v1319_v28 = vpop.xlane.xlu1 %1318 }
 0x52c   : > { %3525 = vrcp.f32 %v1319_v28 }
 0x52d   : > { %3527 = vrcp.f32 %v1310_v27 }
 0x52f   : > { %v1313_v29 = vpop.xlane.xlu1 %1312 }
 0x530   : > { %3529 = vrcp.f32 %v1313_v29 }
 0x531   : > { %v3524_v30 = vpop.eup %3523 }
 0x532   : > { %v1325_v33 = vmul.f32 %v3524_v30, %v3516_v16 }
 0x533   : > { %v1426_v41 = vpop.permute.xlu1 %1425 }
 0x537   : > { %v1478_v44 = vpop.permute.xlu1 %1477 }
 0x539   : > { %v3526_v31 = vpop.eup %3525 }
 0x53a   : > { %v1327_v34 = vmul.f32 %v3526_v31, %v3520_v20  ;;  %v3528_v35 = vpop.eup %3527 }
 0x53b   : > { %v1321_v39 = vmul.f32 %v3528_v35, %v3518_v18 }
 0x53c   : > { %v1329_v36 = vpack.c.bf16 %v1327_v34, %v1325_v33 }
 0x53d   : > { %v3530_v37 = vpop.eup %3529 }
 0x53e   : > { %3198 = vmatmul.mubr.msk.bf16.vlgmr.msra.gmra.mxu0 %vm1283_vm6, %v1329_v36  ;;  %v1323_v40 = vmul.f32 %v3530_v37, %v3522_v22 }
 0x53f   : > { %3208 = vmatpush3.bf16.xpose.msra.mxu0 %v1485_v38  ;;  %3209 = vmatprep.mubr.msk.bf16.mxu0 %vm4081_vm4, %v4080_v32 }
 0x540   : > { %v1328_v42 = vpack.c.bf16 %v1323_v40, %v1321_v39  ;;  %3219 = vmatprep.subr.bf16.mxu0 %v4080_v32 }
 0x542   : > { %3192 = vmatmul.mubr.msk.bf16.vlgmr.msra.gmra.mxu1 %vm1283_vm6, %v1328_v42 }
 0x543   : > { %3202 = vmatpush3.bf16.xpose.msra.mxu1 %v1433_v43  ;;  %3203 = vmatprep.mubr.msk.bf16.mxu1 %vm4081_vm4, %v4080_v32 }
 0x544   : > { %3213 = vmatprep.subr.bf16.mxu1 %v4080_v32 }
 0x546   : > { %3210 = vmatmul.mubr.msk.bf16.vlgmr.msra.gmra.mxu0 %vm1185_vm5, %v1478_v44 }
 0x547   : > { %3221 = vmatprep.mubr.msk.bf16.mxu0 %vm4081_vm4, %v4080_v32 }
 0x54a   : > { %3204 = vmatmul.mubr.msk.bf16.vlgmr.msra.gmra.mxu1 %vm1185_vm5, %v1426_v41 }
 0x54b   : > { %3215 = vmatprep.mubr.msk.bf16.mxu1 %vm4081_vm4, %v4080_v32 }
 0x5fe   : > { %v4600_v46 = vpop.f32.mrf.mxu0 }
 0x600   : > { %v3199_v50 = vpop.f32.mrf.mxu0 }
 0x602   : > { %v4602_v51 = vpop.f32.mrf.mxu1  ;;  %v4604_v52 = vpop.f32.mrf.mxu0 }
 0x604   : > { %v3193_v53 = vpop.f32.mrf.mxu1  ;;  %v3200_v54 = vpop.f32.mrf.mxu0 }
 0x606   : > { %v4606_v55 = vpop.f32.mrf.mxu1  ;;  %v1521_v56 = vpop.f32.mrf.mxu0 }
 0x607   : > { %v1534_v1 = vsel %vm1283_vm6, %v1521_v56, -inf }
 0x608   : > { %v3194_v57 = vpop.f32.mrf.mxu1  ;;  %v3211_v58 = vpop.f32.mrf.mxu0 }
 0x60a   : > { %v1469_v59 = vpop.f32.mrf.mxu1  ;;  %v1524_v60 = vpop.f32.mrf.mxu0 }
 0x60b   : > { %v1528_v61 = vsel %vm1283_vm6, %v1469_v59, -inf  ;;  %v1537_v4 = vsel %vm1283_vm6, %v1524_v60, -inf }
 0x60c   : > { %v3212_v62 = vpop.f32.mrf.mxu0  ;;  %1529 = vmax.xlane.f32.xlu0 %v1528_v61  ;;  %v3205_v63 = vpop.f32.mrf.mxu1 }
 0x60e   : > { %v1472_v0 = vpop.f32.mrf.mxu1 }
 0x60f   : > { %v1531_v2 = vsel %vm1283_vm6, %v1472_v0, -inf }
 0x610   : > { %1535 = vmax.xlane.f32.xlu0 %v1534_v1  ;;  %1532 = vmax.xlane.f32.xlu1 %v1531_v2  ;;  %v3206_v3 = vpop.f32.mrf.mxu1 }
 0x614   : > { %1538 = vmax.xlane.f32.xlu0 %v1537_v4 }
 0x621   : > { %1574 = vrot.lane.b32.xlu1 %v4548_v47, %s4086_s4 }
 0x695   : > { %v1530_v5 = vpop.xlane.xlu0 %1529 }
 0x696   : > { %v1540_v6 = vsub.f32 %v1469_v59, %v1530_v5 }
 0x698   : > { %v1544_v10 = vmul.f32 1.442695, %v1540_v6 }
 0x699   : > { %v1536_v7 = vpop.xlane.xlu0 %1535  ;;  %v1533_v8 = vpop.xlane.xlu1 %1532 }
 0x69a   : > { %v1542_v9 = vsub.f32 %v1521_v56, %v1536_v7  ;;  %v1541_v12 = vsub.f32 %v1472_v0, %v1533_v8 }
 0x69c   : > { %v1548_v11 = vmul.f32 1.442695, %v1542_v9  ;;  %v1546_v16 = vmul.f32 1.442695, %v1541_v12 }
 0x69d   : > { %v1539_v13 = vpop.xlane.xlu0 %1538  ;;  %v1575_v14 = vpop.permute.xlu1 %1574 }
 0x69e   : > { %3531 = vpow2.f32 %v1548_v11  ;;  %v1543_v15 = vsub.f32 %v1524_v60, %v1539_v13  ;;  %3214 = vmatpush3.bf16.msra.mxu1 %v1575_v14 }
 0x69f   : > { %3225 = vmatprep.subr.bf16.mxu1 %v4080_v32  ;;  %3533 = vpow2.f32 %v1544_v10 }
 0x6a0   : > { %v1550_v17 = vmul.f32 1.442695, %v1543_v15 }
 0x6a2   : > { %3535 = vpow2.f32 %v1550_v17 }
 0x6a3   : > { %3537 = vpow2.f32 %v1546_v16 }
 0x6ab   : > { %v3532_v18 = vpop.eup %3531 }
 0x6ac   : > { %v1558_v19 = vsel %vm1283_vm6, %v3532_v18, 0.0  ;;  %v3534_v20 = vpop.eup %3533 }
 0x6ad   : > { %1559 = vadd.xlane.f32.xlu1 %v1558_v19  ;;  %v1552_v23 = vsel %vm1283_vm6, %v3534_v20, 0.0 }
 0x6af   : > { %v3536_v21 = vpop.eup %3535 }
 0x6b0   : > { %v1561_v22 = vsel %vm1283_vm6, %v3536_v21, 0.0  ;;  %v3538_v24 = vpop.eup %3537 }
 0x6b1   : > { %1562 = vadd.xlane.f32.xlu0 %v1561_v22  ;;  %1553 = vadd.xlane.f32.xlu1 %v1552_v23  ;;  %v1555_v25 = vsel %vm1283_vm6, %v3538_v24, 0.0 }
 0x6b5   : > { %1556 = vadd.xlane.f32.xlu0 %v1555_v25 }
 0x6c2   : > { %1670 = vrot.lane.b32.xlu1 %v4548_v47, %s4087_s19 }
 0x6c6   : > { %1721 = vrot.lane.b32.xlu1 %v4553_v49, %s4087_s19  ;;  %s4916_s19 = scalar_lea.vmem [#allocation20], %s4463_s20 }
 0x6ca   : > { %1719 = vrot.lane.b32.xlu1 %v4546_v45, %s4088_s2 }
 0x6cb   : > { %1621 = vrot.lane.b32.xlu0 %v4553_v49, %s4086_s4  ;;  %s4915_s4 = scalar_lea.vmem [#allocation17], %s4463_s20 }
 0x6cf   : > { %1668 = vrot.lane.b32.xlu0 %v4550_v48, %s4088_s2 }
 0x736   : > { %v1560_v26 = vpop.xlane.xlu1 %1559 }
 0x737   : > { %3539 = vrcp.f32 %v1560_v26 }
 0x73a   : > { %v1563_v27 = vpop.xlane.xlu0 %1562  ;;  %v1554_v28 = vpop.xlane.xlu1 %1553 }
 0x73b   : > { %3541 = vrcp.f32 %v1563_v27 }
 0x73c   : > { %3543 = vrcp.f32 %v1554_v28 }
 0x73e   : > { %v1557_v29 = vpop.xlane.xlu0 %1556  ;;  %v1671_v31 = vpop.permute.xlu1 %1670 }
 0x73f   : > { %3545 = vrcp.f32 %v1557_v29  ;;  %v1676_v50 = vsel %vm1185_vm5, %v1671_v31, 0 }
 0x742   : > { %v1622_v30 = vpop.permute.xlu0 %1621  ;;  %v1722_v38 = vpop.permute.xlu1 %1721 }
 0x743   : > { %3220 = vmatpush3.bf16.msra.mxu0 %v1622_v30  ;;  %v1727_v41 = vsel %vm1185_vm5, %v1722_v38, 0 }
 0x744   : > { %3231 = vmatprep.subr.bf16.mxu0 %v4080_v32  ;;  %v3540_v33 = vpop.eup %3539 }
 0x745   : > { %v1569_v35 = vmul.f32 %v3540_v33, %v3532_v18 }
 0x746   : > { %v1720_v53 = vpop.permute.xlu1 %1719  ;;  %v1669_v54 = vpop.permute.xlu0 %1668 }
 0x748   : > { %v3542_v34 = vpop.eup %3541 }
 0x749   : > { %v1571_v36 = vmul.f32 %v3542_v34, %v3536_v21  ;;  %v3544_v37 = vpop.eup %3543 }
 0x74a   : > { %v1565_v42 = vmul.f32 %v3544_v37, %v3534_v20 }
 0x74b   : > { %v1573_v39 = vpack.c.bf16 %v1571_v36, %v1569_v35 }
 0x74c   : > { %v3546_v40 = vpop.eup %3545 }
 0x74d   : > { %3222 = vmatmul.mubr.msk.bf16.vlgmr.msra.gmra.mxu0 %vm1283_vm6, %v1573_v39  ;;  %v1567_v43 = vmul.f32 %v3546_v40, %v3538_v24 }
 0x74e   : > { %3232 = vmatpush3.bf16.xpose.msra.mxu0 %v1727_v41  ;;  %3233 = vmatprep.mubr.msk.bf16.mxu0 %vm4081_vm4, %v4080_v32 }
 0x74f   : > { %v1572_v44 = vpack.c.bf16 %v1567_v43, %v1565_v42  ;;  %3243 = vmatprep.subr.bf16.mxu0 %v4080_v32 }
 0x751   : > { %3216 = vmatmul.mubr.msk.bf16.vlgmr.msra.gmra.mxu1 %vm1283_vm6, %v1572_v44 }
 0x752   : > { %3226 = vmatpush3.bf16.xpose.msra.mxu1 %v1676_v50  ;;  %3227 = vmatprep.mubr.msk.bf16.mxu1 %vm4081_vm4, %v4080_v32 }
 0x753   : > { %3237 = vmatprep.subr.bf16.mxu1 %v4080_v32 }
 0x755   : > { %3234 = vmatmul.mubr.msk.bf16.vlgmr.msra.gmra.mxu0 %vm1185_vm5, %v1720_v53 }
 0x756   : > { %3245 = vmatprep.mubr.msk.bf16.mxu0 %vm4081_vm4, %v4080_v32 }
 0x759   : > { %3228 = vmatmul.mubr.msk.bf16.vlgmr.msra.gmra.mxu1 %vm1185_vm5, %v1669_v54 }
 0x75a   : > { %3239 = vmatprep.mubr.msk.bf16.mxu1 %vm4081_vm4, %v4080_v32 }
 0x80d   : > { %v4642_v56 = vpop.f32.mrf.mxu0 }
 0x80f   : > { %v3223_v57 = vpop.f32.mrf.mxu0 }
 0x811   : > { %v4644_v58 = vpop.f32.mrf.mxu1  ;;  %v4646_v59 = vpop.f32.mrf.mxu0 }
 0x812   : > { %v3480_v60 = vpack.i.bf16 %v4646_v59, %v4642_v56 }
 0x813   : > { %v3217_v61 = vpop.f32.mrf.mxu1  ;;  %v3224_v62 = vpop.f32.mrf.mxu0 }
 0x815   : > { %v4650_v63 = vpop.f32.mrf.mxu1  ;;  %v1763_v0 = vpop.f32.mrf.mxu0 }
 0x816   : > { %v3475_v1 = vpack.i.bf16 %v4650_v63, %v4644_v58  ;;  %v1776_v10 = vsel %vm1283_vm6, %v1763_v0, -inf }
 0x817   : > { %v3218_v2 = vpop.f32.mrf.mxu1  ;;  %v3235_v3 = vpop.f32.mrf.mxu0 }
 0x819   : > { %v1712_v4 = vpop.f32.mrf.mxu1  ;;  %v1766_v5 = vpop.f32.mrf.mxu0 }
 0x81a   : > { %v1770_v6 = vsel %vm1283_vm6, %v1712_v4, -inf  ;;  %v1779_v13 = vsel %vm1283_vm6, %v1766_v5, -inf }
 0x81b   : > { %v3236_v7 = vpop.f32.mrf.mxu0  ;;  %1771 = vmax.xlane.f32.xlu0 %v1770_v6  ;;  %v3229_v8 = vpop.f32.mrf.mxu1 }
 0x81d   : > { %v1715_v9 = vpop.f32.mrf.mxu1 }
 0x81e   : > { %v1773_v11 = vsel %vm1283_vm6, %v1715_v9, -inf }
 0x81f   : > { %1777 = vmax.xlane.f32.xlu0 %v1776_v10  ;;  %1774 = vmax.xlane.f32.xlu1 %v1773_v11  ;;  %v3230_v12 = vpop.f32.mrf.mxu1 }
 0x823   : > { %1780 = vmax.xlane.f32.xlu0 %v1779_v13 }
 0x830   : > { %1816 = vrot.lane.b32.xlu1 %v4548_v47, %s4089_s22 }
 0x8a4   : > { %v1772_v14 = vpop.xlane.xlu0 %1771 }
 0x8a5   : > { %v1782_v15 = vsub.f32 %v1712_v4, %v1772_v14 }
 0x8a7   : > { %v1786_v19 = vmul.f32 1.442695, %v1782_v15 }
 0x8a8   : > { %v1778_v16 = vpop.xlane.xlu0 %1777  ;;  %v1775_v17 = vpop.xlane.xlu1 %1774 }
 0x8a9   : > { %v1784_v18 = vsub.f32 %v1763_v0, %v1778_v16  ;;  %v1783_v21 = vsub.f32 %v1715_v9, %v1775_v17 }
 0x8ab   : > { %v1790_v20 = vmul.f32 1.442695, %v1784_v18  ;;  %v1788_v25 = vmul.f32 1.442695, %v1783_v21 }
 0x8ac   : > { %v1781_v22 = vpop.xlane.xlu0 %1780  ;;  %v1817_v23 = vpop.permute.xlu1 %1816 }
 0x8ad   : > { %3547 = vpow2.f32 %v1790_v20  ;;  %v1785_v24 = vsub.f32 %v1766_v5, %v1781_v22  ;;  %3238 = vmatpush3.bf16.msra.mxu1 %v1817_v23 }
 0x8ae   : > { %3249 = vmatprep.subr.bf16.mxu1 %v4080_v32  ;;  %3549 = vpow2.f32 %v1786_v19 }
 0x8af   : > { %v1792_v26 = vmul.f32 1.442695, %v1785_v24 }
 0x8b1   : > { %3551 = vpow2.f32 %v1792_v26 }
 0x8b2   : > { %3553 = vpow2.f32 %v1788_v25 }
 0x8ba   : > { %v3548_v27 = vpop.eup %3547 }
 0x8bb   : > { %v1800_v28 = vsel %vm1283_vm6, %v3548_v27, 0.0  ;;  %v3550_v29 = vpop.eup %3549 }
 0x8bc   : > { %1801 = vadd.xlane.f32.xlu1 %v1800_v28  ;;  %v1794_v33 = vsel %vm1283_vm6, %v3550_v29, 0.0 }
 0x8be   : > { %v3552_v30 = vpop.eup %3551 }
 0x8bf   : > { %v1803_v31 = vsel %vm1283_vm6, %v3552_v30, 0.0  ;;  %v3554_v34 = vpop.eup %3553 }
 0x8c0   : > { %1804 = vadd.xlane.f32.xlu0 %v1803_v31  ;;  %1795 = vadd.xlane.f32.xlu1 %v1794_v33  ;;  %v1797_v35 = vsel %vm1283_vm6, %v3554_v34, 0.0 }
 0x8c4   : > { %1798 = vadd.xlane.f32.xlu0 %v1797_v35 }
 0x8d1   : > { %1912 = vrot.lane.b32.xlu1 %v4548_v47, %s4090_s24 }
 0x8d5   : > { %1963 = vrot.lane.b32.xlu1 %v4553_v49, %s4090_s24 }
 0x8d9   : > { %1961 = vrot.lane.b32.xlu1 %v4546_v45, %s4091_s13 }
 0x8da   : > { %1863 = vrot.lane.b32.xlu0 %v4553_v49, %s4089_s22 }
 0x8de   : > { %1910 = vrot.lane.b32.xlu0 %v4550_v48, %s4091_s13 }
 0x945   : > { %v1802_v36 = vpop.xlane.xlu1 %1801 }
 0x946   : > { %3555 = vrcp.f32 %v1802_v36 }
 0x949   : > { %v1805_v37 = vpop.xlane.xlu0 %1804  ;;  %v1796_v38 = vpop.xlane.xlu1 %1795 }
 0x94a   : > { %3557 = vrcp.f32 %v1805_v37 }
 0x94b   : > { %3559 = vrcp.f32 %v1796_v38 }
 0x94d   : > { %v1799_v39 = vpop.xlane.xlu0 %1798  ;;  %v1913_v41 = vpop.permute.xlu1 %1912 }
 0x94e   : > { %3561 = vrcp.f32 %v1799_v39  ;;  %v1918_v2 = vsel %vm1185_vm5, %v1913_v41, 0 }
 0x951   : > { %v1864_v40 = vpop.permute.xlu0 %1863  ;;  %v1964_v53 = vpop.permute.xlu1 %1963 }
 0x952   : > { %3244 = vmatpush3.bf16.msra.mxu0 %v1864_v40  ;;  %v1969_v57 = vsel %vm1185_vm5, %v1964_v53, 0 }
 0x953   : > { %3255 = vmatprep.subr.bf16.mxu0 %v4080_v32  ;;  %v3556_v42 = vpop.eup %3555 }
 0x954   : > { %v1811_v43 = vmul.f32 %v3556_v42, %v3548_v27 }
 0x955   : > { %v1962_v3 = vpop.permute.xlu1 %1961  ;;  %v1911_v4 = vpop.permute.xlu0 %1910 }
 0x957   : > { %v3558_v45 = vpop.eup %3557 }
 0x958   : > { %v1813_v44 = vmul.f32 %v3558_v45, %v3552_v30  ;;  %v3560_v50 = vpop.eup %3559 }
 0x959   : > { %v1807_v61 = vmul.f32 %v3560_v50, %v3550_v29 }
 0x95a   : > { %v1815_v48 = vpack.c.bf16 %v1813_v44, %v1811_v43 }
 0x95b   : > { %v3562_v54 = vpop.eup %3561 }
 0x95c   : > { %3246 = vmatmul.mubr.msk.bf16.vlgmr.msra.gmra.mxu0 %vm1283_vm6, %v1815_v48  ;;  %v1809_v62 = vmul.f32 %v3562_v54, %v3554_v34 }
 0x95d   : > { %3256 = vmatpush3.bf16.xpose.msra.mxu0 %v1969_v57  ;;  %3257 = vmatprep.mubr.msk.bf16.mxu0 %vm4081_vm4, %v4080_v32 }
 0x95e   : > { %v1814_v0 = vpack.c.bf16 %v1809_v62, %v1807_v61  ;;  %3267 = vmatprep.subr.bf16.mxu0 %v4080_v32 }
 0x960   : > { %3240 = vmatmul.mubr.msk.bf16.vlgmr.msra.gmra.mxu1 %vm1283_vm6, %v1814_v0 }
 0x961   : > { %3250 = vmatpush3.bf16.xpose.msra.mxu1 %v1918_v2  ;;  %3251 = vmatprep.mubr.msk.bf16.mxu1 %vm4081_vm4, %v4080_v32 }
 0x962   : > { %3261 = vmatprep.subr.bf16.mxu1 %v4080_v32 }
 0x964   : > { %3258 = vmatmul.mubr.msk.bf16.vlgmr.msra.gmra.mxu0 %vm1185_vm5, %v1962_v3  ;;  %v3507_v3 = vld [vmem:[%s4909_s14 + $0x8] sm:$0xff]  }
 0x965   : > { %3269 = vmatprep.mubr.msk.bf16.mxu0 %vm4081_vm4, %v4080_v32 }
 0x968   : > { %3252 = vmatmul.mubr.msk.bf16.vlgmr.msra.gmra.mxu1 %vm1185_vm5, %v1911_v4  ;;  %v3508_v4 = vld [vmem:[%s4910_s21] sm:$0xff]  }
 0x969   : > { %3263 = vmatprep.mubr.msk.bf16.mxu1 %vm4081_vm4, %v4080_v32 }
 0xa1c   : > { %v1903_v5 = vpop.f32.mrf.mxu0 }
 0xa1e   : > { %v3247_v6 = vpop.f32.mrf.mxu0 }
 0xa20   : > { %v1856_v7 = vpop.f32.mrf.mxu1  ;;  %v1906_v8 = vpop.f32.mrf.mxu0 }
 0xa21   : > { %v3490_v9 = vpack.i.bf16 %v1906_v8, %v1903_v5 }
 0xa22   : > { %v3241_v10 = vpop.f32.mrf.mxu1  ;;  %v3248_v11 = vpop.f32.mrf.mxu0 }
 0xa24   : > { %v1859_v12 = vpop.f32.mrf.mxu1  ;;  %v2005_v13 = vpop.f32.mrf.mxu0 }
 0xa25   : > { %v3485_v14 = vpack.i.bf16 %v1859_v12, %v1856_v7  ;;  %v2018_v22 = vsel %vm1283_vm6, %v2005_v13, -inf }
 0xa26   : > { %v3242_v15 = vpop.f32.mrf.mxu1  ;;  %v3259_v16 = vpop.f32.mrf.mxu0 }
 0xa28   : > { %v1954_v17 = vpop.f32.mrf.mxu1  ;;  %v2008_v18 = vpop.f32.mrf.mxu0 }
 0xa29   : > { %v2012_v19 = vsel %vm1283_vm6, %v1954_v17, -inf  ;;  %v2021_v25 = vsel %vm1283_vm6, %v2008_v18, -inf }
 0xa2a   : > { %v3260_v20 = vpop.f32.mrf.mxu0  ;;  %2013 = vmax.xlane.f32.xlu0 %v2012_v19  ;;  %v3253_v21 = vpop.f32.mrf.mxu1 }
 0xa2c   : > { %v1957_v32 = vpop.f32.mrf.mxu1 }
 0xa2d   : > { %v2015_v23 = vsel %vm1283_vm6, %v1957_v32, -inf }
 0xa2e   : > { %2019 = vmax.xlane.f32.xlu0 %v2018_v22  ;;  %2016 = vmax.xlane.f32.xlu1 %v2015_v23  ;;  %v3254_v24 = vpop.f32.mrf.mxu1 }
 0xa32   : > { %2022 = vmax.xlane.f32.xlu0 %v2021_v25 }
 0xab3   : > { %v2014_v26 = vpop.xlane.xlu0 %2013 }
 0xab4   : > { %v2024_v27 = vsub.f32 %v1954_v17, %v2014_v26 }
 0xab6   : > { %v2028_v31 = vmul.f32 1.442695, %v2024_v27 }
 0xab7   : > { %v2020_v28 = vpop.xlane.xlu0 %2019  ;;  %v2017_v29 = vpop.xlane.xlu1 %2016 }
 0xab8   : > { %v2026_v30 = vsub.f32 %v2005_v13, %v2020_v28  ;;  %v2025_v34 = vsub.f32 %v1957_v32, %v2017_v29 }
 0xaba   : > { %v2032_v33 = vmul.f32 1.442695, %v2026_v30  ;;  %v2030_v37 = vmul.f32 1.442695, %v2025_v34 }
 0xabb   : > { %v2023_v35 = vpop.xlane.xlu0 %2022 }
 0xabc   : > { %3563 = vpow2.f32 %v2032_v33  ;;  %v2027_v36 = vsub.f32 %v2008_v18, %v2023_v35 }
 0xabd   : > { %3565 = vpow2.f32 %v2028_v31 }
 0xabe   : > { %v2034_v38 = vmul.f32 1.442695, %v2027_v36 }
 0xac0   : > { %3567 = vpow2.f32 %v2034_v38 }
 0xac1   : > { %3569 = vpow2.f32 %v2030_v37 }
 0xac9   : > { %v3564_v39 = vpop.eup %3563 }
 0xaca   : > { %v2042_v40 = vsel %vm1283_vm6, %v3564_v39, 0.0  ;;  %v3566_v41 = vpop.eup %3565 }
 0xacb   : > { %2043 = vadd.xlane.f32.xlu1 %v2042_v40  ;;  %v2036_v43 = vsel %vm1283_vm6, %v3566_v41, 0.0 }
 0xacd   : > { %v3568_v42 = vpop.eup %3567 }
 0xace   : > { %v2045_v45 = vsel %vm1283_vm6, %v3568_v42, 0.0  ;;  %v3570_v44 = vpop.eup %3569 }
 0xacf   : > { %2046 = vadd.xlane.f32.xlu0 %v2045_v45  ;;  %2037 = vadd.xlane.f32.xlu1 %v2036_v43  ;;  %v2039_v50 = vsel %vm1283_vm6, %v3570_v44, 0.0  ;;  %v3075_v43 = vld [vmem:[%s4911_s30] ss:$0 sm:$0xff] }
 0xad3   : > { %2040 = vadd.xlane.f32.xlu0 %v2039_v50 }
 0xae0   : > { %2058 = vrot.lane.b32.xlu1 %v4548_v47, %s4092_s28 }
 0xae4   : > { %3476 = vrot.lane.b32.xlu1 %v3475_v1, %s4093_s15 }
 0xae8   : > { %3481 = vrot.lane.b32.xlu1 %v3480_v60, %s4093_s15 }
 0xae9   : > { %2105 = vrot.lane.b32.xlu0 %v4553_v49, %s4092_s28 }
 0xaec   : > { %3491 = vrot.lane.b32.xlu1 %v3490_v9, %s4094_s27 }
 0xaed   : > { %3486 = vrot.lane.b32.xlu0 %v3485_v14, %s4094_s27 }
 0xb54   : > { %v2044_v53 = vpop.xlane.xlu1 %2043 }
 0xb55   : > { %3571 = vrcp.f32 %v2044_v53 }
 0xb58   : > { %v2047_v48 = vpop.xlane.xlu0 %2046  ;;  %v2038_v54 = vpop.xlane.xlu1 %2037 }
 0xb59   : > { %3573 = vrcp.f32 %v2047_v48 }
 0xb5a   : > { %3575 = vrcp.f32 %v2038_v54  ;;  %v3595_v54 = vld [vmem:[#allocation2] sm:$0xff] }
 0xb5c   : > { %v2041_v47 = vpop.xlane.xlu0 %2040  ;;  %v2059_v57 = vpop.permute.xlu1 %2058 }
 0xb5d   : > { %3577 = vrcp.f32 %v2041_v47  ;;  %3262 = vmatpush3.bf16.msra.mxu1 %v2059_v57 }
 0xb5e   : > { %3273 = vmatprep.subr.bf16.mxu1 %v3507_v3 }
 0xb60   : > { %v2106_v58 = vpop.permute.xlu0 %2105  ;;  %v3477_v15 = vpop.permute.xlu1 %3476 }
 0xb61   : > { %3268 = vmatpush3.bf16.msra.mxu0 %v2106_v58  ;;  %v3479_v19 = vunpack.i.h.bf16 %v3477_v15  ;;  %v3478_v20 = vunpack.i.l.bf16 %v3477_v15 }
 0xb62   : > { %v3572_v56 = vpop.eup %3571 }
 0xb63   : > { %v2053_v60 = vmul.f32 %v3572_v56, %v3564_v39  ;;  %v2201_v29 = vsel %vm1185_vm5, %v4606_v55, %v3479_v19  ;;  %v2200_v30 = vsel %vm1185_vm5, %v4602_v51, %v3478_v20 }
 0xb64   : > { %v3482_v16 = vpop.permute.xlu1 %3481  ;;  %v3487_v18 = vpop.permute.xlu0 %3486 }
 0xb65   : > { %v3484_v21 = vunpack.i.h.bf16 %v3482_v16  ;;  %v3483_v32 = vunpack.i.l.bf16 %v3482_v16  ;;  %v3489_v25 = vunpack.i.h.bf16 %v3487_v18  ;;  %v3488_v26 = vunpack.i.l.bf16 %v3487_v18 }
 0xb66   : > { %v3574_v59 = vpop.eup %3573 }
 0xb67   : > { %v3576_v49 = vpop.eup %3575  ;;  %v2055_v63 = vmul.f32 %v3574_v59, %v3568_v42  ;;  %v2203_v31 = vsel %vm1185_vm5, %v4604_v52, %v3484_v21  ;;  %v2202_v33 = vsel %vm1185_vm5, %v4600_v46, %v3483_v32  ;;  %v2204_v39 = vsel %vm1283_vm6, %v2200_v30, %v3488_v26 }
 0xb68   : > { %v2049_v62 = vmul.f32 %v3576_v49, %v3566_v41  ;;  %v3492_v17 = vpop.permute.xlu1 %3491  ;;  %v2205_v55 = vsel %vm1283_vm6, %v2201_v29, %v3489_v25  ;;  %v3596_v49 = vld [vmem:[#allocation2 + $0x10] sm:$0xff]  ;;  %v3511_v25 = vld [vmem:[%s4513_s26 + $0x18] sm:$0xff]  }
 0xb69   : > { %v2057_v61 = vpack.c.bf16 %v2055_v63, %v2053_v60  ;;  %v3494_v22 = vunpack.i.h.bf16 %v3492_v17  ;;  %v3493_v23 = vunpack.i.l.bf16 %v3492_v17  ;;  %v3597_v63 = vld [vmem:[#allocation2 + $0x8] sm:$0xff] }
 0xb6a   : > { %v3578_v1 = vpop.eup %3577 }
 0xb6b   : > { %v2051_v0 = vmul.f32 %v3578_v1, %v3570_v44  ;;  %3270 = vmatmul.mubr.msk.bf16.vlgmr.msra.gmra.mxu0 %vm1283_vm6, %v2057_v61  ;;  %v2206_v35 = vsel %vm1283_vm6, %v2202_v33, %v3493_v23  ;;  %v2207_v36 = vsel %vm1283_vm6, %v2203_v31, %v3494_v22  ;;  %v3509_v23 = vld [vmem:[%s4912_s11 + $0x8] sm:$0xff]  }
 0xb6c   : > { %3281 = vmatprep.subr.bf16.mxu0 %v3509_v23 }
 0xb6d   : > { %v2056_v2 = vpack.c.bf16 %v2051_v0, %v2049_v62  ;;  %v3598_v0 = vld [vmem:[#allocation2 + $0x18] sm:$0xff]  ;;  %3282 = vmatpush3.bf16.msra.mxu0 %v3509_v23 }
 0xb6f   : > { %3264 = vmatmul.mubr.msk.bf16.vlgmr.msra.gmra.mxu1 %vm1283_vm6, %v2056_v2 }
 0xb70   : > { %3274 = vmatpush3.bf16.msra.mxu1 %v3507_v3 }
 0xb71   : > { %3275 = vmatprep.subr.bf16.mxu1 %v3508_v4 }
 0xb74   : > { %3276 = vmatpush3.bf16.msra.mxu1 %v3508_v4 }
 0xb75   : > { %3289 = vmatprep.subr.bf16.mxu1 %v3511_v25 }
 0xc2b   : > { %v2145_v5 = vpop.f32.mrf.mxu0 }
 0xc2d   : > { %v3271_v6 = vpop.f32.mrf.mxu0 }
 0xc2f   : > { %v2098_v7 = vpop.f32.mrf.mxu1  ;;  %v2148_v8 = vpop.f32.mrf.mxu0 }
 0xc30   : > { %v3500_v9 = vpack.i.bf16 %v2148_v8, %v2145_v5 }
 0xc31   : > { %v3265_v10 = vpop.f32.mrf.mxu1  ;;  %v3272_v11 = vpop.f32.mrf.mxu0 }
 0xc32   : > { %3501 = vrot.lane.b32.xlu1 %v3500_v9, %s4095_s29 }
 0xc33   : > { %v2101_v12 = vpop.f32.mrf.mxu1 }
 0xc34   : > { %v3495_v13 = vpack.i.bf16 %v2101_v12, %v2098_v7 }
 0xc35   : > { %v3266_v14 = vpop.f32.mrf.mxu1 }
 0xc36   : > { %3496 = vrot.lane.b32.xlu0 %v3495_v13, %s4095_s29 }
 0xca4   : > { %v3502_v24 = vpop.permute.xlu1 %3501 }
 0xca5   : > { %v3504_v27 = vunpack.i.h.bf16 %v3502_v24  ;;  %v3503_v28 = vunpack.i.l.bf16 %v3502_v24  ;;  %v3510_v24 = vld [vmem:[%s4913_s16] sm:$0xff]  }
 0xca6   : > { %3283 = vmatprep.subr.bf16.mxu0 %v3510_v24 }
 0xca7   : > { %v2211_v40 = vsel %vm2208_vm7, %v2206_v35, %v3503_v28  ;;  %v2212_v51 = vsel %vm2208_vm7, %v2207_v36, %v3504_v27  ;;  %3284 = vmatpush3.bf16.msra.mxu0 %v3510_v24 }
 0xca8   : > { %v3497_v34 = vpop.permute.xlu0 %3496  ;;  %v2214_v45 = vpack.c.bf16 %v2212_v51, %v2211_v40  ;;  %v3080_v40 = vld [vmem:[%s4914_s1] ss:$0 sm:$0xff] }
 0xca9   : > { %v3499_v37 = vunpack.i.h.bf16 %v3497_v34  ;;  %v3498_v38 = vunpack.i.l.bf16 %v3497_v34 }
 0xcab   : > { %v2210_v41 = vsel %vm2208_vm7, %v2205_v55, %v3499_v37  ;;  %v2209_v42 = vsel %vm2208_vm7, %v2204_v39, %v3498_v38 }
 0xcac   : > { %v2213_v52 = vpack.c.bf16 %v2210_v41, %v2209_v42 }
 0xcae   : > { %3277 = vmatprep.mubr.msk.bf16.mxu1 %vm1118_vm3, %v2213_v52 }
 0xcaf   : > { %3278 = vmatmul.mubr.msk.bf16.vlgmr.msra.gmra.mxu1 %vm1118_vm3, %v2214_v45 }
 0xcb0   : > { %3290 = vmatpush3.bf16.msra.mxu1 %v3511_v25 }
 0xd6f   : > { %v3279_v46 = vpop.f32.mrf.mxu1 }
 0xd70   : > { %v2287_v50 = vadd.f32 %v3279_v46, %v3075_v43  ;;  %v3081_v46 = vld [vmem:[%s4915_s4] ss:$0 sm:$0xff] }
 0xd71   : > { %v2278_v44 = vpop.f32.mrf.mxu1 }
 0xd72   : > { %v2279_v53 = vadd.f32 %v3075_v43, %v2278_v44  ;;  %v2295_v60 = vadd.f32 %v3596_v49, %v2287_v50  ;;  %v3512_v49 = vld [vmem:[%s4513_s26 + $0x10] sm:$0xff]  }
 0xd73   : > { %v3280_v48 = vpop.f32.mrf.mxu1  ;;  %3291 = vmatprep.subr.bf16.mxu1 %v3512_v49 }
 0xd74   : > { %v2293_v47 = vadd.f32 %v3595_v54, %v2279_v53  ;;  %v2290_v58 = vadd.f32 %v3280_v48, %v3075_v43  ;;  %v2305_v62 = vsel %vm1118_vm3, %v2295_v60, 0.0  ;;  %3292 = vmatpush3.bf16.msra.mxu1 %v3512_v49 }
 0xd75   : > { %v2281_v57 = vpop.f32.mrf.mxu1 }
 0xd76   : > { %v2282_v56 = vadd.f32 %v3075_v43, %v2281_v57  ;;  %v2299_v59 = vsel %vm1118_vm3, %v2293_v47, 0.0  ;;  %v2296_v2 = vadd.f32 %v3598_v0, %v2290_v58 }
 0xd77   : > { %2300 = vadd.xlane.f32.xlu0 %v2299_v59 }
 0xd78   : > { %v2294_v1 = vadd.f32 %v3597_v63, %v2282_v56  ;;  %v2308_v3 = vsel %vm1118_vm3, %v2296_v2, 0.0  ;;  %v3514_v63 = vld [vmem:[%s4513_s26] sm:$0xff]  }
 0xd7a   : > { %v2302_v61 = vsel %vm1118_vm3, %v2294_v1, 0.0 }
 0xd7b   : > { %2303 = vadd.xlane.f32.xlu1 %v2302_v61  ;;  %2306 = vadd.xlane.f32.xlu0 %v2305_v62  ;;  %v3082_v62 = vld [vmem:[%s4916_s19] ss:$0 sm:$0xff] }
 0xd7f   : > { %2309 = vadd.xlane.f32.xlu0 %v2308_v3 }
 0xe00   : > { %v2301_v4 = vpop.xlane.xlu0 %2300 }
 0xe01   : > { %v2312_v5 = vmul.f32 0.03125, %v2301_v4 }
 0xe03   : > { %v2316_v6 = vsub.f32 %v2293_v47, %v2312_v5 }
 0xe04   : > { %v2304_v7 = vpop.xlane.xlu1 %2303  ;;  %v2307_v8 = vpop.xlane.xlu0 %2306 }
 0xe05   : > { %v2313_v9 = vmul.f32 0.03125, %v2304_v7  ;;  %v2314_v10 = vmul.f32 0.03125, %v2307_v8  ;;  %v2320_v11 = vmul.f32 %v2316_v6, %v2316_v6 }
 0xe07   : > { %v2317_v12 = vsub.f32 %v2294_v1, %v2313_v9  ;;  %v2318_v13 = vsub.f32 %v2295_v60, %v2314_v10  ;;  %v2324_v14 = vsel %vm1118_vm3, %v2320_v11, 0.0  ;;  %v3513_v60 = vld [vmem:[%s4513_s26 + $0x8] sm:$0xff]   ;;  %s4917_s26 = scalar_lea.vmem [#allocation21], %s4463_s20 }
 0xe08   : > { %2325 = vadd.xlane.f32.xlu1 %v2324_v14  ;;  %v2310_v15 = vpop.xlane.xlu0 %2309  ;;  %3293 = vmatprep.subr.bf16.mxu1 %v3513_v60  ;;  %v3087_v14 = vld [vmem:[%s4917_s26] ss:$0 sm:$0xff] }
 0xe09   : > { %v2315_v16 = vmul.f32 0.03125, %v2310_v15  ;;  %v2321_v17 = vmul.f32 %v2317_v12, %v2317_v12  ;;  %v2322_v18 = vmul.f32 %v2318_v13, %v2318_v13  ;;  %3294 = vmatpush3.bf16.msra.mxu1 %v3513_v60 }
 0xe0a   : > { %3295 = vmatprep.subr.bf16.mxu1 %v3514_v63 }
 0xe0b   : > { %v2319_v19 = vsub.f32 %v2296_v2, %v2315_v16  ;;  %v2327_v20 = vsel %vm1118_vm3, %v2321_v17, 0.0  ;;  %v2330_v21 = vsel %vm1118_vm3, %v2322_v18, 0.0 }
 0xe0c   : > { %2328 = vadd.xlane.f32.xlu0 %v2327_v20  ;;  %2331 = vadd.xlane.f32.xlu1 %v2330_v21 }
 0xe0d   : > { %v2323_v32 = vmul.f32 %v2319_v19, %v2319_v19  ;;  %3296 = vmatpush3.bf16.msra.mxu1 %v3514_v63 }
 0xe0f   : > { %v2333_v22 = vsel %vm1118_vm3, %v2323_v32, 0.0 }
 0xe10   : > { %2334 = vadd.xlane.f32.xlu0 %v2333_v22 }
 0xe91   : > { %v2326_v26 = vpop.xlane.xlu1 %2325 }
 0xe92   : > { %v2336_v27 = vmul.f32 0.03125, %v2326_v26 }
 0xe94   : > { %v2340_v28 = vadd.f32 1e-05, %v2336_v27 }
 0xe95   : > { %v2332_v29 = vpop.xlane.xlu1 %2331  ;;  %v2329_v30 = vpop.xlane.xlu0 %2328 }
 0xe96   : > { %3579 = vrsqrt.f32 %v2340_v28  ;;  %v2338_v31 = vmul.f32 0.03125, %v2332_v29  ;;  %v2337_v33 = vmul.f32 0.03125, %v2329_v30 }
 0xe98   : > { %v2342_v34 = vadd.f32 1e-05, %v2338_v31  ;;  %v2341_v35 = vadd.f32 1e-05, %v2337_v33 }
 0xe99   : > { %v2335_v36 = vpop.xlane.xlu0 %2334 }
 0xe9a   : > { %3581 = vrsqrt.f32 %v2342_v34  ;;  %v2339_v37 = vmul.f32 0.03125, %v2335_v36 }
 0xe9b   : > { %3583 = vrsqrt.f32 %v2341_v35 }
 0xe9c   : > { %v2343_v38 = vadd.f32 1e-05, %v2339_v37 }
 0xe9e   : > { %3585 = vrsqrt.f32 %v2343_v38 }
 0xea3   : > { %v3580_v39 = vpop.eup %3579 }
 0xea4   : > { %v2348_v55 = vmul.f32 %v3580_v39, %v2316_v6 }
 0xea6   : > { %v2358_v45 = vmul.f32 %v3080_v40, %v2348_v55 }
 0xea7   : > { %v3582_v51 = vpop.eup %3581 }
 0xea8   : > { %v3584_v41 = vpop.eup %3583  ;;  %v2350_v42 = vmul.f32 %v3582_v51, %v2318_v13  ;;  %v2368_v48 = vadd.f32 %v3081_v46, %v2358_v45 }
 0xea9   : > { %v2349_v52 = vmul.f32 %v3584_v41, %v2317_v12 }
 0xeaa   : > { %v2360_v53 = vmul.f32 %v3080_v40, %v2350_v42 }
 0xeab   : > { %v3586_v43 = vpop.eup %3585  ;;  %v2359_v44 = vmul.f32 %v3080_v40, %v2349_v52 }
 0xeac   : > { %v2351_v50 = vmul.f32 %v3586_v43, %v2319_v19  ;;  %v2370_v58 = vadd.f32 %v3081_v46, %v2360_v53 }
 0xead   : > { %v2369_v54 = vadd.f32 %v3081_v46, %v2359_v44 }
 0xeae   : > { %v2361_v47 = vmul.f32 %v3080_v40, %v2351_v50 }
 0xeaf   : > { %v2372_v57 = vpack.c.bf16 %v2369_v54, %v2368_v48 }
 0xeb0   : > { %v2371_v56 = vadd.f32 %v3081_v46, %v2361_v47 }
 0xeb1   : > { %3285 = vmatprep.mubr.msk.bf16.mxu0 %vm1118_vm3, %v2372_v57 }
 0xeb2   : > { %v2373_v59 = vpack.c.bf16 %v2371_v56, %v2370_v58 }
 0xeb4   : > { %3286 = vmatmul.mubr.msk.bf16.vlgmr.msra.gmra.mxu0 %vm1118_vm3, %v2373_v59 }
 0xf74   : > { %v3287_v1 = vpop.f32.mrf.mxu0 }
 0xf75   : > { %v2446_v4 = vadd.f32 %v3287_v1, %v3082_v62 }
 0xf76   : > { %v2437_v61 = vpop.f32.mrf.mxu0 }
 0xf77   : > { %v2438_v2 = vadd.f32 %v3082_v62, %v2437_v61  ;;  %v2454_v10 = vmax.f32 %v2446_v4, 0.0  ;;  %v3094_v61 = vld [vmem:[%s994_s25] ss:$0 sm:$0xff] }
 0xf78   : > { %v3288_v0 = vpop.f32.mrf.mxu0 }
 0xf79   : > { %v2449_v3 = vadd.f32 %v3288_v0, %v3082_v62  ;;  %v2452_v8 = vmax.f32 %v2438_v2, 0.0  ;;  %v3095_v0 = vld [vmem:[%s997_s23] ss:$0 sm:$0xff]  ;;  %s4920_s23 = sld [smem:[#allocation36_spill]] }
 0xf7a   : > { %v2440_v5 = vpop.f32.mrf.mxu0 }
 0xf7b   : > { %v2441_v6 = vadd.f32 %v3082_v62, %v2440_v5  ;;  %v2455_v7 = vmax.f32 %v2449_v3, 0.0 }
 0xf7d   : > { %v2453_v9 = vmax.f32 %v2441_v6, 0.0  ;;  %v2457_v12 = vpack.c.bf16 %v2455_v7, %v2454_v10 }
 0xf7f   : > { %v2456_v11 = vpack.c.bf16 %v2453_v9, %v2452_v8  ;;  %p3096_p0 = scmp.ne.s32.totalorder %s4920_s23, 1 }
 0xf80   : > { %s4921_s15 = sld [smem:[#allocation53_spill]] (!%p3096_p0) }
 0xf81   : > { %3297 = vmatprep.mubr.msk.bf16.mxu1 %vm2497_vm8, %v2456_v11 }
 0xf82   : > { %3298 = vmatmul.mubr.msk.bf16.vlgmr.msra.gmra.mxu1 %vm2497_vm8, %v2457_v12 }
0x1042   : > { %v3299_v13 = vpop.f32.mrf.mxu1 }
0x1043   : > { %v2547_v16 = vadd.f32 %v3299_v13, %v3087_v14 }
0x1044   : > { %v2538_v15 = vpop.f32.mrf.mxu1 }
0x1045   : > { %v2539_v17 = vadd.f32 %v3087_v14, %v2538_v15  ;;  %v2555_v23 = vadd.f32 %v2547_v16, %v2370_v58 }
0x1046   : > { %v3300_v18 = vpop.f32.mrf.mxu1 }
0x1047   : > { %v2553_v19 = vadd.f32 %v2539_v17, %v2368_v48  ;;  %v2550_v21 = vadd.f32 %v3300_v18, %v3087_v14  ;;  %v2565_v26 = vsel %vm1118_vm3, %v2555_v23, 0.0 }
0x1048   : > { %v2541_v20 = vpop.f32.mrf.mxu1 }
0x1049   : > { %v2542_v32 = vadd.f32 %v3087_v14, %v2541_v20  ;;  %v2559_v22 = vsel %vm1118_vm3, %v2553_v19, 0.0  ;;  %v2556_v27 = vadd.f32 %v2550_v21, %v2371_v56 }
0x104a   : > { %2560 = vadd.xlane.f32.xlu1 %v2559_v22 }
0x104b   : > { %v2554_v24 = vadd.f32 %v2542_v32, %v2369_v54  ;;  %v2568_v28 = vsel %vm1118_vm3, %v2556_v27, 0.0 }
0x104d   : > { %v2562_v25 = vsel %vm1118_vm3, %v2554_v24, 0.0 }
0x104e   : > { %2563 = vadd.xlane.f32.xlu0 %v2562_v25  ;;  %2566 = vadd.xlane.f32.xlu1 %v2565_v26 }
0x1052   : > { %2569 = vadd.xlane.f32.xlu0 %v2568_v28 }
0x10d3   : > { %v2561_v29 = vpop.xlane.xlu1 %2560 }
0x10d4   : > { %v2571_v30 = vmul.f32 0.03125, %v2561_v29 }
0x10d6   : > { %v2575_v31 = vsub.f32 %v2553_v19, %v2571_v30 }
0x10d7   : > { %v2564_v33 = vpop.xlane.xlu0 %2563  ;;  %v2567_v34 = vpop.xlane.xlu1 %2566 }
0x10d8   : > { %v2572_v35 = vmul.f32 0.03125, %v2564_v33  ;;  %v2573_v36 = vmul.f32 0.03125, %v2567_v34  ;;  %v2579_v37 = vmul.f32 %v2575_v31, %v2575_v31 }
0x10da   : > { %v2576_v38 = vsub.f32 %v2554_v24, %v2572_v35  ;;  %v2577_v39 = vsub.f32 %v2555_v23, %v2573_v36  ;;  %v2583_v55 = vsel %vm1118_vm3, %v2579_v37, 0.0 }
0x10db   : > { %v2570_v40 = vpop.xlane.xlu0 %2569  ;;  %2584 = vadd.xlane.f32.xlu1 %v2583_v55 }
0x10dc   : > { %v2574_v51 = vmul.f32 0.03125, %v2570_v40  ;;  %v2580_v41 = vmul.f32 %v2576_v38, %v2576_v38  ;;  %v2581_v42 = vmul.f32 %v2577_v39, %v2577_v39 }
0x10de   : > { %v2578_v52 = vsub.f32 %v2556_v27, %v2574_v51  ;;  %v2586_v45 = vsel %vm1118_vm3, %v2580_v41, 0.0  ;;  %v2589_v46 = vsel %vm1118_vm3, %v2581_v42, 0.0 }
0x10df   : > { %2587 = vadd.xlane.f32.xlu0 %v2586_v45  ;;  %2590 = vadd.xlane.f32.xlu1 %v2589_v46 }
0x10e0   : > { %v2582_v43 = vmul.f32 %v2578_v52, %v2578_v52 }
0x10e2   : > { %v2592_v44 = vsel %vm1118_vm3, %v2582_v43, 0.0 }
0x10e3   : > { %2593 = vadd.xlane.f32.xlu0 %v2592_v44 }
0x1164   : > { %v2585_v50 = vpop.xlane.xlu1 %2584 }
0x1165   : > { %v2595_v53 = vmul.f32 0.03125, %v2585_v50 }
0x1167   : > { %v2599_v48 = vadd.f32 1e-05, %v2595_v53 }
0x1168   : > { %v2588_v54 = vpop.xlane.xlu0 %2587  ;;  %v2591_v47 = vpop.xlane.xlu1 %2590 }
0x1169   : > { %3587 = vrsqrt.f32 %v2599_v48  ;;  %v2596_v57 = vmul.f32 0.03125, %v2588_v54  ;;  %v2597_v58 = vmul.f32 0.03125, %v2591_v47 }
0x116b   : > { %v2600_v56 = vadd.f32 1e-05, %v2596_v57  ;;  %v2601_v59 = vadd.f32 1e-05, %v2597_v58 }
0x116c   : > { %v2594_v49 = vpop.xlane.xlu0 %2593 }
0x116d   : > { %3589 = vrsqrt.f32 %v2600_v56  ;;  %v2598_v60 = vmul.f32 0.03125, %v2594_v49 }
0x116e   : > { %3591 = vrsqrt.f32 %v2601_v59 }
0x116f   : > { %v2602_v63 = vadd.f32 1e-05, %v2598_v60 }
0x1171   : > { %3593 = vrsqrt.f32 %v2602_v63 }
0x1176   : > { %v3588_v1 = vpop.eup %3587 }
0x1177   : > { %v2607_v62 = vmul.f32 %v3588_v1, %v2575_v31 }
0x1179   : > { %v2617_v2 = vmul.f32 %v3094_v61, %v2607_v62 }
0x117a   : > { %v3590_v3 = vpop.eup %3589 }
0x117b   : > { %v3592_v4 = vpop.eup %3591  ;;  %v2627_v5 = vadd.f32 %v3095_v0, %v2617_v2  ;;  %v2608_v6 = vmul.f32 %v3590_v3, %v2576_v38 }
0x117c   : > { %v2609_v7 = vmul.f32 %v3592_v4, %v2577_v39 }
0x117d   : > { %2631 = vst.msk [vmem:[#allocation2] sm:$0xff] %vm1118_vm3, %v2627_v5  ;;  %v2618_v8 = vmul.f32 %v3094_v61, %v2608_v6 }
0x117e   : > { %v3594_v9 = vpop.eup %3593  ;;  %v2619_v10 = vmul.f32 %v3094_v61, %v2609_v7 }
0x117f   : > { %v2628_v11 = vadd.f32 %v3095_v0, %v2618_v8  ;;  %v2610_v12 = vmul.f32 %v3594_v9, %v2578_v52 }
0x1180   : > { %v2629_v13 = vadd.f32 %v3095_v0, %v2619_v10 }
0x1181   : > { %2632 = vst.msk [vmem:[#allocation2 + $0x8] sm:$0xff] %vm1118_vm3, %v2628_v11  ;;  %v2620_v14 = vmul.f32 %v3094_v61, %v2610_v12  ;;  %2638 = sbr.rel (%p3096_p0) target bundleno = 4695 (0x1257), region = 152 }
0x1182   : > { %2633 = vst.msk [vmem:[#allocation2 + $0x10] sm:$0xff] %vm1118_vm3, %v2629_v13 }
0x1183   : > { %v2630_v15 = vadd.f32 %v3095_v0, %v2620_v14 }
0x1185   : > { %2634 = vst.msk [vmem:[#allocation2 + $0x18] sm:$0xff] %vm1118_vm3, %v2630_v15 }
0x1186   : > { %v2643_v16 = vld [vmem:[#allocation23 + $0x10] sm:$0xff]  ;;  %v2644_v17 = vld [vmem:[#allocation23 + $0x18] sm:$0xff]  ;;  %v2641_v18 = vld [vmem:[#allocation23] sm:$0xff]  ;;  %v2639_v19 = vpack.c.bf16 %v2628_v11, %v2628_v11  ;;  %v2640_v20 = vpack.c.bf16 %v2630_v15, %v2630_v15  ;;  %v4096_v21 = vmov 0.0   ;;  %vm4097_vm9 = vmmov 0  }
0x1187   : > { %3301 = vmatprep.subr.bf16.mxu0 %v4096_v21  ;;  %v2646_v32 = vpack.c.bf16 %v2644_v17, %v2643_v16  ;;  %v2642_v22 = vld [vmem:[#allocation23 + $0x8] sm:$0xff]  ;;  %3305 = vmatprep.mubr.msk.bf16.mxu0 %vm4097_vm9, %v4096_v21  ;;  %vm2660_vm10 = vcmask 1041409   ;;  %v3097_v30 = vld [vmem:[%s4921_s15] ss:$0 sm:$0xff]  ;;  %vm2706_vm11 = vcmask 25600  }
0x1188   : > { %v2656_v23 = vunpack.c.l.b16 %v2639_v19  ;;  %v2657_v24 = vunpack.c.l.b16 %v2640_v20  ;;  %v2645_v25 = vpack.c.bf16 %v2642_v22, %v2641_v18 }
0x1189   : > { %3302 = vmatpush3.bf16.msra.mxu0 %v2646_v32 }
0x118a   : > { %3303 = vmatprep.subr.bf16.mxu0 %v4096_v21  ;;  %v2658_v26 = vrot.slane %v2656_v23, 7  ;;  %v2659_v27 = vrot.slane %v2657_v24, 6 }
0x118c   : > { %v2661_v28 = vsel %vm2660_vm10, %v2659_v27, %v2658_v26 }
0x118d   : > { %3304 = vmatpush3.bf16.msra.mxu0 %v2645_v25  ;;  %v2662_v29 = vpack.c.b16 %v2661_v28, %v2661_v28 }
0x1190   : > { %3306 = vmatmul.mubr.msk.bf16.vlgmr.msra.gmra.mxu0 %vm1118_vm3, %v2662_v29 }
0x1250   : > { %v2700_v31 = vpop.f32.mrf.mxu0 }
0x1251   : > { %v2701_v33 = vadd.f32 %v3097_v30, %v2700_v31 }
0x1252   : > { %v3307_v34 = vpop.f32.mrf.mxu0 }
0x1253   : > { %2707 = vst.msk [vmem:[#allocation24] sm:$0x3] %vm2706_vm11, %v2701_v33 }
0x1254   : > { %v2703_v35 = vpop.f32.mrf.mxu0 }
0x1256   : > { %v3308_v36 = vpop.f32.mrf.mxu0 }
0x1257 PF: > { %s4922_s27 = sld [smem:[#allocation38_spill]]  ;;  %s4098_s14 = smov [#allocation24]  }
0x1258   : > { %s2717_s21 = sshll.u32 %s4098_s14, 4  ;;  %s2718_s21 = int_to_ptr.vmem [resolvable:$true] %s2717_s21 }
0x1259   : > { %s3955_s29 = scalar_lea.vmem %s2718_s21, 32  ;;  %p3962_p12 = scmp.lt.s32.totalorder %s2718_s21, %s2718_s21 }
0x125a   : > { %p3956_p4 = scmp.ne.s32.totalorder %s2718_s21, %s3955_s29  ;;  %p3963_p13 = scmp.lt.s32.totalorder %s3955_s29, %s3955_s29 }
0x125c   : > { %p3964_p8 = por %p3963_p13, %p3962_p12 }
0x125d   : > { %p3398_p1 = scmp.eq.s32.totalorder %s4922_s27, 1 }
0x125f   : > { %p3957_p3 = pnand %p3956_p4, %p3398_p1 }
0x1261   : > { %p3958_p7 = pneg %p3957_p3 }
0x1263   : > { %p3965_p2 = pnand %p3964_p8, %p3958_p7 }
0x1265   : > { %3968 = shalt.err (!%p3965_p2)
}
0x1266   : > { %s4923_s16 = sld [smem:[#allocation54_spill]] }
0x126c   : > { %3345 = dma.vmem_to_hbm [thread:$0]  (%p3398_p1), %s2718_s21, 32, %s4923_s16, [#allocation5]  }
0x126d   : > { %4036 = dma.done.wait (%p3398_p1), [#allocation5], 32  }
0x126e   : > { %4038 = vsyncadd (%p3398_p1), [#allocation5], 4294967264 }
0x126f PF: > { %s4924_s1 = sld [smem:[#allocation37_spill]]  ;;  %s4929_s30 = smov %s4057_s0 }
0x1270   : > { %s4925_s27 = sld [smem:[#allocation34_spill]] }
0x1271   : > { %s4926_s28 = sld [smem:[#allocation35_spill]] }
0x1272   : > { %s4927_s29 = sld [smem:[#allocation42_spill]] }
0x1273   : > { %s4928_s4 = sld [smem:[#allocation41_spill]] }
0x1275   : > { %s46_s19 = sadd.s32 1, %s4924_s1  }
0x1276   : > { %p43_p10 = scmp.ge.s32.totalorder %s46_s19, 4  }
0x1278   :  { %45 = sbr.rel (!%p43_p10) target bundleno = 28 (0x1c), region = 263 }
0x1279   : > { %s4930_s0 = smov %s4928_s4 }
0x127d   :  { %2730 = vsyncpa [#allocation4], 1 }
0x127e   :  { %2732 = vsyncpa [#allocation4 + $0x1], 1 }
0x127f   :  { %2733 = vsyncpa [#allocation7], 1 }
0x1280   :  { %2734 = vsyncpa [#allocation10], 1 }
0x1281   :  { %2736 = vsyncpa [#allocation10 + $0x1], 1 }
0x1282   :  { %2737 = vsyncpa [#allocation13], 1 }
0x1283   :  { %2739 = vsyncpa [#allocation13 + $0x1], 1 }
0x1284   :  { %2740 = vsyncpa [#allocation16], 1 }
0x1285   :  { %2742 = vsyncpa [#allocation16 + $0x1], 1 }
0x1286   :  { %2743 = vsyncpa [#allocation19], 1 }
0x1287   :  { %2745 = vsyncpa [#allocation19 + $0x1], 1 }
0x1288   :  { %2746 = vsyncpa [#allocation22], 1 }
0x1289   :  { %2748 = vsyncpa [#allocation22 + $0x1], 1 }
0x128a   :  { %2749 = vsyncpa [#allocation5], 1 }
0x128b   :  { %2751 = vsyncpa [#allocation5 + $0x1], 1 }

</bundles_post_ra>
